<compile_context>
chip_gen: v7x
topology: tpu7x:2x2x1
jax: 0.10.0
libtpu: 0.0.40
codegen_flags: <defaults>
</compile_context>

<pallas_src>
import jax
import jax.numpy as jnp
from jax.experimental import pallas as pl
from jax.experimental.pallas import tpu as pltpu

FEATURE_DIM = 1024
HID1 = 512
HID2 = 256
OUT_DIM = 4
BOX_DIM = 4
OUT_PAD = 128   # lane-dense output width (fc3 zero-padded to this)


def _mlp_kernel(feat_ref, box_ref,
                w1f_ref, w1b_ref, b1_ref,
                w2_ref, b2_ref,
                w3_ref, b3_ref,
                out_ref):
    # fc1, feature part: bf16 operands on the MXU, f32 accumulation.
    h1 = jnp.dot(feat_ref[...].astype(jnp.bfloat16), w1f_ref[...],
                 preferred_element_type=jnp.float32)
    # fc1, box part (K=4): VPU broadcast-FMAs, f32, instead of a padded MXU pass.
    box = box_ref[...]                       # [tb, 4]    f32
    w1b = w1b_ref[...]                       # [4, HID1]  f32
    for k in range(BOX_DIM):
        h1 = h1 + box[:, k:k + 1] * w1b[k:k + 1, :]
    h1 = jnp.maximum(h1 + b1_ref[...], 0.0)  # bias + ReLU in f32

    # fc2
    h2 = jnp.dot(h1.astype(jnp.bfloat16), w2_ref[...],
                 preferred_element_type=jnp.float32)
    h2 = jnp.maximum(h2 + b2_ref[...], 0.0)

    # fc3 (weights zero-padded to 128 lanes -> lane-dense, unmasked stores)
    out = jnp.dot(h2.astype(jnp.bfloat16), w3_ref[...],
                  preferred_element_type=jnp.float32)
    out_ref[...] = (out + b3_ref[...]).astype(out_ref.dtype)


def speaker_predictor_pallas(listener_feature, listener_box, params, *, tile_b=512):
    """listener_feature: [B, 1024] f32, listener_box: [B, 4] f32 -> [B, 4] f32."""
    w1f, w1b, b1, w2, b2, w3, b3 = params
    B = listener_feature.shape[0]
    assert listener_feature.shape == (B, FEATURE_DIM)
    assert listener_box.shape == (B, BOX_DIM)

    # MXU weights in bf16 (halves weight HBM/VMEM traffic); biases and the tiny
    # box weight (used on the VPU) stay f32 for accuracy.
    w1f_bf = w1f.astype(jnp.bfloat16)
    w2_bf = w2.astype(jnp.bfloat16)
    w3_pad = jnp.zeros((HID2, OUT_PAD), jnp.bfloat16).at[:, :OUT_DIM].set(
        w3.astype(jnp.bfloat16))
    b3_pad = jnp.zeros((1, OUT_PAD), jnp.float32).at[:, :OUT_DIM].set(b3)

    # Tile big enough to fill the MXU, but >= 2 grid steps for large batches so
    # both v7x TensorCores get work.  No jnp.pad of the inputs: grid = cdiv(B, tb);
    # a partial last block only writes back the valid rows.
    half = -(-B // 2)                               # ceil(B/2)
    tb = min(tile_b, max(8, ((half + 7) // 8) * 8))
    grid = (pl.cdiv(B, tb),)

    def batch_spec(cols):
        return pl.BlockSpec((tb, cols), lambda i: (i, 0))

    def full_spec(shape):
        # Constant index_map: the weight block never re-DMAs after step 0.
        return pl.BlockSpec(shape, lambda i: (0,) * len(shape))

    flops = 2 * B * (FEATURE_DIM * HID1 + HID1 * HID2 + HID2 * OUT_PAD)
    bytes_accessed = (
        (w1f_bf.size + w2_bf.size + w3_pad.size) * 2
        + (w1b.size + b1.size + b2.size + b3_pad.size) * 4
        + B * (FEATURE_DIM + BOX_DIM + OUT_PAD) * 4)

    out = pl.pallas_call(
        _mlp_kernel,
        out_shape=jax.ShapeDtypeStruct((B, OUT_PAD), jnp.float32),
        grid_spec=pltpu.PrefetchScalarGridSpec(
            num_scalar_prefetch=0,
            grid=grid,
            in_specs=[
                batch_spec(FEATURE_DIM),          # listener_feature tile (f32; cast in-kernel)
                batch_spec(BOX_DIM),              # listener_box tile (f32)
                full_spec((FEATURE_DIM, HID1)),   # W1 feature part (bf16, MXU)
                full_spec((BOX_DIM, HID1)),       # W1 box part (f32, VPU)
                full_spec((1, HID1)),             # b1
                full_spec((HID1, HID2)),          # W2 (bf16)
                full_spec((1, HID2)),             # b2
                full_spec((HID2, OUT_PAD)),       # W3 zero-padded (bf16)
                full_spec((1, OUT_PAD)),          # b3 zero-padded
            ],
            out_specs=batch_spec(OUT_PAD),
        ),
        compiler_params=pltpu.CompilerParams(
            dimension_semantics=("parallel",),
        ),
        cost_estimate=pl.CostEstimate(
            flops=flops, transcendentals=0, bytes_accessed=bytes_accessed),
    )(listener_feature, listener_box,
      w1f_bf, w1b, b1, w2_bf, b2, w3_pad, b3_pad)

    return out[:, :OUT_DIM]


def init_params(key):
    """Deterministic init matching the torch Linear shapes (stored as [in, out])."""
    ks = jax.random.split(key, 6)
    in1 = FEATURE_DIM + BOX_DIM
    lim1 = 1.0 / jnp.sqrt(in1)
    lim2 = 1.0 / jnp.sqrt(HID1)
    lim3 = 1.0 / jnp.sqrt(HID2)
    w1 = jax.random.uniform(ks[0], (in1, HID1), jnp.float32, -lim1, lim1)
    b1 = jax.random.uniform(ks[1], (1, HID1), jnp.float32, -lim1, lim1)
    w2 = jax.random.uniform(ks[2], (HID1, HID2), jnp.float32, -lim2, lim2)
    b2 = jax.random.uniform(ks[3], (1, HID2), jnp.float32, -lim2, lim2)
    w3 = jax.random.uniform(ks[4], (HID2, OUT_DIM), jnp.float32, -lim3, lim3)
    b3 = jax.random.uniform(ks[5], (1, OUT_DIM), jnp.float32, -lim3, lim3)
    w1f, w1b = w1[:FEATURE_DIM], w1[FEATURE_DIM:]
    return (w1f, w1b, b1, w2, b2, w3, b3)


def reference_forward(listener_feature, listener_box, params):
    w1f, w1b, b1, w2, b2, w3, b3 = params
    x = jnp.concatenate([listener_feature, listener_box], axis=-1)
    w1 = jnp.concatenate([w1f, w1b], axis=0)
    x = jax.nn.relu(x @ w1 + b1)
    x = jax.nn.relu(x @ w2 + b2)
    return x @ w3 + b3


if __name__ == "__main__":
    key = jax.random.PRNGKey(0)
    k_feat, k_box, k_param = jax.random.split(key, 3)

    B = 8  # small batch
    listener_feature = jax.random.normal(k_feat, (B, FEATURE_DIM), jnp.float32)
    listener_box = jax.random.uniform(k_box, (B, BOX_DIM), jnp.float32)

    params = init_params(k_param)

    out = speaker_predictor_pallas(listener_feature, listener_box, params)
    out = jax.block_until_ready(out)

    ref = reference_forward(listener_feature, listener_box, params)
    assert out.shape == (B, OUT_DIM)
    # bf16 MXU operands with f32 accumulation -> ~1e-2 relative error vs f32 ref.
    assert jnp.allclose(out, ref, atol=5e-2, rtol=5e-2), "mismatch vs pure-JAX reference"

    print("KERNEL_OK")
</pallas_src>

<mosaic_0001>
module attributes {stable_mosaic.version = 11 : i64} {
  func.func @_mlp_kernel(%arg0: i32, %arg1: memref<8x1024xf32, #tpu.memory_space<vmem>>, %arg2: memref<8x4xf32, #tpu.memory_space<vmem>>, %arg3: memref<1024x512xbf16, #tpu.memory_space<vmem>>, %arg4: memref<4x512xf32, #tpu.memory_space<vmem>>, %arg5: memref<1x512xf32, #tpu.memory_space<vmem>>, %arg6: memref<512x256xbf16, #tpu.memory_space<vmem>>, %arg7: memref<1x256xf32, #tpu.memory_space<vmem>>, %arg8: memref<256x128xbf16, #tpu.memory_space<vmem>>, %arg9: memref<1x128xf32, #tpu.memory_space<vmem>>, %arg10: memref<8x128xf32, #tpu.memory_space<vmem>>) attributes {dimension_semantics = [#tpu.dimension_semantics<parallel>], iteration_bounds = array<i64: 1>, scalar_prefetch = 0 : i64, scratch_operands = 0 : i64, tpu.core_type = #tpu.core_type<tc>, window_params = [{transform_indices = @transform_0, window_bounds = array<i64: 8, 1024>}, {transform_indices = @transform_1, window_bounds = array<i64: 8, 4>}, {pipeline_mode = #tpu.pipeline_mode<synchronous>, transform_indices = @transform_2, window_bounds = array<i64: 1024, 512>}, {pipeline_mode = #tpu.pipeline_mode<synchronous>, transform_indices = @transform_3, window_bounds = array<i64: 4, 512>}, {pipeline_mode = #tpu.pipeline_mode<synchronous>, transform_indices = @transform_4, window_bounds = array<i64: 1, 512>}, {pipeline_mode = #tpu.pipeline_mode<synchronous>, transform_indices = @transform_5, window_bounds = array<i64: 512, 256>}, {pipeline_mode = #tpu.pipeline_mode<synchronous>, transform_indices = @transform_6, window_bounds = array<i64: 1, 256>}, {pipeline_mode = #tpu.pipeline_mode<synchronous>, transform_indices = @transform_7, window_bounds = array<i64: 256, 128>}, {pipeline_mode = #tpu.pipeline_mode<synchronous>, transform_indices = @transform_8, window_bounds = array<i64: 1, 128>}, {transform_indices = @transform_9, window_bounds = array<i64: 8, 128>}]} {
    %c0 = arith.constant 0 : index
    %c0_0 = arith.constant 0 : index
    %0 = vector.load %arg1[%c0, %c0_0] : memref<8x1024xf32, #tpu.memory_space<vmem>>, vector<8x1024xf32>
    %1 = arith.truncf %0 : vector<8x1024xf32> to vector<8x1024xbf16>
    %c0_1 = arith.constant 0 : index
    %c0_2 = arith.constant 0 : index
    %2 = vector.load %arg3[%c0_1, %c0_2] : memref<1024x512xbf16, #tpu.memory_space<vmem>>, vector<1024x512xbf16>
    %cst = arith.constant dense<0.000000e+00> : vector<8x512xf32>
    %3 = tpu.matmul %1, %2, %cst {dimension_numbers = #tpu.dot_dimension_numbers<[1], [0], [0], [1], [0, 0, 1, 1], [], []>} : vector<8x1024xbf16>, vector<1024x512xbf16>, vector<8x512xf32> -> vector<8x512xf32>
    %c0_3 = arith.constant 0 : index
    %c0_4 = arith.constant 0 : index
    %4 = vector.load %arg2[%c0_3, %c0_4] : memref<8x4xf32, #tpu.memory_space<vmem>>, vector<8x4xf32>
    %c0_5 = arith.constant 0 : index
    %c0_6 = arith.constant 0 : index
    %5 = vector.load %arg4[%c0_5, %c0_6] : memref<4x512xf32, #tpu.memory_space<vmem>>, vector<4x512xf32>
    %6 = vector.extract_strided_slice %4 {offsets = [0, 0], sizes = [8, 1], strides = [1, 1]} : vector<8x4xf32> to vector<8x1xf32>
    %7 = vector.extract_strided_slice %5 {offsets = [0, 0], sizes = [1, 512], strides = [1, 1]} : vector<4x512xf32> to vector<1x512xf32>
    %8 = vector.broadcast %6 : vector<8x1xf32> to vector<8x512xf32>
    %9 = vector.broadcast %7 : vector<1x512xf32> to vector<8x512xf32>
    %10 = arith.mulf %8, %9 : vector<8x512xf32>
    %11 = arith.addf %3, %10 : vector<8x512xf32>
    %12 = vector.extract_strided_slice %4 {offsets = [0, 1], sizes = [8, 1], strides = [1, 1]} : vector<8x4xf32> to vector<8x1xf32>
    %13 = vector.extract_strided_slice %5 {offsets = [1, 0], sizes = [1, 512], strides = [1, 1]} : vector<4x512xf32> to vector<1x512xf32>
    %14 = vector.broadcast %12 : vector<8x1xf32> to vector<8x512xf32>
    %15 = vector.broadcast %13 : vector<1x512xf32> to vector<8x512xf32>
    %16 = arith.mulf %14, %15 : vector<8x512xf32>
    %17 = arith.addf %11, %16 : vector<8x512xf32>
    %18 = vector.extract_strided_slice %4 {offsets = [0, 2], sizes = [8, 1], strides = [1, 1]} : vector<8x4xf32> to vector<8x1xf32>
    %19 = vector.extract_strided_slice %5 {offsets = [2, 0], sizes = [1, 512], strides = [1, 1]} : vector<4x512xf32> to vector<1x512xf32>
    %20 = vector.broadcast %18 : vector<8x1xf32> to vector<8x512xf32>
    %21 = vector.broadcast %19 : vector<1x512xf32> to vector<8x512xf32>
    %22 = arith.mulf %20, %21 : vector<8x512xf32>
    %23 = arith.addf %17, %22 : vector<8x512xf32>
    %24 = vector.extract_strided_slice %4 {offsets = [0, 3], sizes = [8, 1], strides = [1, 1]} : vector<8x4xf32> to vector<8x1xf32>
    %25 = vector.extract_strided_slice %5 {offsets = [3, 0], sizes = [1, 512], strides = [1, 1]} : vector<4x512xf32> to vector<1x512xf32>
    %26 = vector.broadcast %24 : vector<8x1xf32> to vector<8x512xf32>
    %27 = vector.broadcast %25 : vector<1x512xf32> to vector<8x512xf32>
    %28 = arith.mulf %26, %27 : vector<8x512xf32>
    %29 = arith.addf %23, %28 : vector<8x512xf32>
    %c0_7 = arith.constant 0 : index
    %c0_8 = arith.constant 0 : index
    %30 = vector.load %arg5[%c0_7, %c0_8] : memref<1x512xf32, #tpu.memory_space<vmem>>, vector<1x512xf32>
    %31 = vector.broadcast %30 : vector<1x512xf32> to vector<8x512xf32>
    %32 = arith.addf %29, %31 : vector<8x512xf32>
    %cst_9 = arith.constant 0.000000e+00 : f32
    %33 = vector.broadcast %cst_9 : f32 to vector<8x512xf32>
    %34 = arith.maximumf %32, %33 : vector<8x512xf32>
    %35 = arith.truncf %34 : vector<8x512xf32> to vector<8x512xbf16>
    %c0_10 = arith.constant 0 : index
    %c0_11 = arith.constant 0 : index
    %36 = vector.load %arg6[%c0_10, %c0_11] : memref<512x256xbf16, #tpu.memory_space<vmem>>, vector<512x256xbf16>
    %cst_12 = arith.constant dense<0.000000e+00> : vector<8x256xf32>
    %37 = tpu.matmul %35, %36, %cst_12 {dimension_numbers = #tpu.dot_dimension_numbers<[1], [0], [0], [1], [0, 0, 1, 1], [], []>} : vector<8x512xbf16>, vector<512x256xbf16>, vector<8x256xf32> -> vector<8x256xf32>
    %c0_13 = arith.constant 0 : index
    %c0_14 = arith.constant 0 : index
    %38 = vector.load %arg7[%c0_13, %c0_14] : memref<1x256xf32, #tpu.memory_space<vmem>>, vector<1x256xf32>
    %39 = vector.broadcast %38 : vector<1x256xf32> to vector<8x256xf32>
    %40 = arith.addf %37, %39 : vector<8x256xf32>
    %cst_15 = arith.constant 0.000000e+00 : f32
    %41 = vector.broadcast %cst_15 : f32 to vector<8x256xf32>
    %42 = arith.maximumf %40, %41 : vector<8x256xf32>
    %43 = arith.truncf %42 : vector<8x256xf32> to vector<8x256xbf16>
    %c0_16 = arith.constant 0 : index
    %c0_17 = arith.constant 0 : index
    %44 = vector.load %arg8[%c0_16, %c0_17] : memref<256x128xbf16, #tpu.memory_space<vmem>>, vector<256x128xbf16>
    %cst_18 = arith.constant dense<0.000000e+00> : vector<8x128xf32>
    %45 = tpu.matmul %43, %44, %cst_18 {dimension_numbers = #tpu.dot_dimension_numbers<[1], [0], [0], [1], [0, 0, 1, 1], [], []>} : vector<8x256xbf16>, vector<256x128xbf16>, vector<8x128xf32> -> vector<8x128xf32>
    %c0_19 = arith.constant 0 : index
    %c0_20 = arith.constant 0 : index
    %46 = vector.load %arg9[%c0_19, %c0_20] : memref<1x128xf32, #tpu.memory_space<vmem>>, vector<1x128xf32>
    %47 = vector.broadcast %46 : vector<1x128xf32> to vector<8x128xf32>
    %48 = arith.addf %45, %47 : vector<8x128xf32>
    %c0_21 = arith.constant 0 : index
    %c0_22 = arith.constant 0 : index
    %49 = vector.load %arg10[%c0_21, %c0_22] : memref<8x128xf32, #tpu.memory_space<vmem>>, vector<8x128xf32>
    tpu.vector_store %arg10[%c0_21, %c0_22], %48 {strides = array<i32>} : memref<8x128xf32, #tpu.memory_space<vmem>>, vector<8x128xf32>,
    return
  }
  func.func @transform_0(%arg0: i32) -> (i32, i32) {
    %c0_i32 = arith.constant 0 : i32
    %c0_i32_0 = arith.constant 0 : i32
    return %arg0, %c0_i32 : i32, i32
  }
  func.func @transform_1(%arg0: i32) -> (i32, i32) {
    %c0_i32 = arith.constant 0 : i32
    %c0_i32_0 = arith.constant 0 : i32
    return %arg0, %c0_i32 : i32, i32
  }
  func.func @transform_2(%arg0: i32) -> (i32, i32) {
    %c0_i32 = arith.constant 0 : i32
    %c0_i32_0 = arith.constant 0 : i32
    %c0_i32_1 = arith.constant 0 : i32
    return %c0_i32, %c0_i32_0 : i32, i32
  }
  func.func @transform_3(%arg0: i32) -> (i32, i32) {
    %c0_i32 = arith.constant 0 : i32
    %c0_i32_0 = arith.constant 0 : i32
    %c0_i32_1 = arith.constant 0 : i32
    return %c0_i32, %c0_i32_0 : i32, i32
  }
  func.func @transform_4(%arg0: i32) -> (i32, i32) {
    %c0_i32 = arith.constant 0 : i32
    %c0_i32_0 = arith.constant 0 : i32
    %c0_i32_1 = arith.constant 0 : i32
    return %c0_i32, %c0_i32_0 : i32, i32
  }
  func.func @transform_5(%arg0: i32) -> (i32, i32) {
    %c0_i32 = arith.constant 0 : i32
    %c0_i32_0 = arith.constant 0 : i32
    %c0_i32_1 = arith.constant 0 : i32
    return %c0_i32, %c0_i32_0 : i32, i32
  }
  func.func @transform_6(%arg0: i32) -> (i32, i32) {
    %c0_i32 = arith.constant 0 : i32
    %c0_i32_0 = arith.constant 0 : i32
    %c0_i32_1 = arith.constant 0 : i32
    return %c0_i32, %c0_i32_0 : i32, i32
  }
  func.func @transform_7(%arg0: i32) -> (i32, i32) {
    %c0_i32 = arith.constant 0 : i32
    %c0_i32_0 = arith.constant 0 : i32
    %c0_i32_1 = arith.constant 0 : i32
    return %c0_i32, %c0_i32_0 : i32, i32
  }
  func.func @transform_8(%arg0: i32) -> (i32, i32) {
    %c0_i32 = arith.constant 0 : i32
    %c0_i32_0 = arith.constant 0 : i32
    %c0_i32_1 = arith.constant 0 : i32
    return %c0_i32, %c0_i32_0 : i32, i32
  }
  func.func @transform_9(%arg0: i32) -> (i32, i32) {
    %c0_i32 = arith.constant 0 : i32
    %c0_i32_0 = arith.constant 0 : i32
    return %arg0, %c0_i32 : i32, i32
  }
}

</mosaic_0001>

<bundles_post_ra>
// kernel: tpu_custom_call.1
= control target key start
LH: loop header
LB: loop body
LE: loop exit
PB: predicated region body
PF: predicated region fallthrough
CT: control target
= control target key end

     0   :  { %14 = vsyncpa [#allocation3], 0  ;;  %s4181_s0 = inlined_call_operand.hbm [shape: f32[8,1024], index: 0, kind: input, shape index: {}]   ;;  %s4182_s1 = inlined_call_operand.vmem [shape: f32[8,4], index: 1, kind: input, shape index: {}]   ;;  %s4183_s2 = inlined_call_operand.hbm [shape: bf16[1024,512], index: 2, kind: input, shape index: {}]   ;;  %s4184_s3 = inlined_call_operand.vmem [shape: f32[4,512], index: 3, kind: input, shape index: {}]   ;;  %s4185_s4 = inlined_call_operand.vmem [shape: f32[1,512], index: 4, kind: input, shape index: {}]   ;;  %s4186_s5 = inlined_call_operand.hbm [shape: bf16[512,256], index: 5, kind: input, shape index: {}]   ;;  %s4187_s6 = inlined_call_operand.vmem [shape: f32[1,256], index: 6, kind: input, shape index: {}]   ;;  %s4188_s7 = inlined_call_operand.hbm [shape: bf16[256,128], index: 7, kind: input, shape index: {}]   ;;  %s4189_s8 = inlined_call_operand.vmem [shape: f32[1,128], index: 8, kind: input, shape index: {}]   ;;  %s4190_s9 = inlined_call_operand.hbm [shape: f32[8,128], index: 9, kind: output, shape index: {}]  }
   0x1   :  { %15 = vsyncpa [#allocation6], 0 }
   0x2   :  { %16 = vsyncpa [#allocation9], 0 }
   0x3   :  { %17 = vsyncpa [#allocation4], 0  ;;  %s3869_s30 = smov [#allocation5]   ;;  %s3751_s13 = scalar_lea.hbm %s4183_s2, 32768 }
   0x4   :  { %s35_s10 = sshll.u32 %s3869_s30, 4  ;;  %p3752_p0 = scmp.ne.s32.totalorder %s4183_s2, %s3751_s13  ;;  %s36_s10 = int_to_ptr.vmem [resolvable:$true] %s35_s10 }
   0x5   :  { %p3755_p1 = scmp.lt.u32.totalorder %s3751_s13, %s4183_s2 }
   0x7   :  { %p3757_p2 = pnand %p3755_p1, %p3752_p0 }
   0x9   :  { %3760 = shalt.err (!%p3757_p2)
}
   0xa   :  { %s3761_s18 = scalar_lea.vmem %s36_s10, 32768  ;;  %p3766_p4 = scmp.lt.s32.totalorder %s36_s10, %s36_s10 }
   0xb   :  { %p3762_p3 = scmp.ne.s32.totalorder %s36_s10, %s3761_s18  ;;  %p3767_p5 = scmp.lt.s32.totalorder %s3761_s18, %s3761_s18 }
   0xd   :  { %p3768_p6 = por %p3767_p5, %p3766_p4 }
   0xf   :  { %p3769_p7 = pnand %p3768_p6, %p3762_p3 }
  0x11   :  { %3772 = shalt.err (!%p3769_p7)
}
  0x12   :  { %s3870_s19 = smov 256   ;;  %s3871_s20 = smov 16  }
  0x13   :  { %41 = dma.hbm_to_vmem [thread:$0]  %s4183_s2, 32768, %s36_s10, [#allocation6], %s3870_s19, %s3870_s19, %s3871_s20  }
  0x14   :  { %s3872_s23 = smov [#allocation2]   ;;  %s3873_s25 = smov [#allocation7]  }
  0x15   :  { %s24_s24 = sshll.u32 %s3872_s23, 4  ;;  %s51_s26 = sshll.u32 %s3873_s25, 4  ;;  %s25_s24 = int_to_ptr.vmem [resolvable:$true] %s24_s24  ;;  %s52_s26 = int_to_ptr.vmem [resolvable:$true] %s51_s26 }
  0x16   :  { %s3773_s29 = scalar_lea.hbm %s4181_s0, 1024 }
  0x17   :  { %p3774_p8 = scmp.ne.s32.totalorder %s4181_s0, %s3773_s29  ;;  %p3777_p9 = scmp.lt.u32.totalorder %s3773_s29, %s4181_s0 }
  0x19   :  { %p3779_p10 = pnand %p3777_p9, %p3774_p8 }
  0x1b   :  { %3782 = shalt.err (!%p3779_p10)
}
  0x1c   :  { %s3783_s2 = scalar_lea.vmem %s25_s24, 1024  ;;  %p3788_p12 = scmp.lt.s32.totalorder %s25_s24, %s25_s24 }
  0x1d   :  { %p3784_p11 = scmp.ne.s32.totalorder %s25_s24, %s3783_s2  ;;  %p3789_p13 = scmp.lt.s32.totalorder %s3783_s2, %s3783_s2 }
  0x1f   :  { %p3790_p0 = por %p3789_p13, %p3788_p12 }
  0x21   :  { %p3791_p1 = pnand %p3790_p0, %p3784_p11 }
  0x23   :  { %3794 = shalt.err (!%p3791_p1)
}
  0x24   :  { %27 = dma.hbm_to_vmem [thread:$0]  %s4181_s0, 1024, %s25_s24, [#allocation3]  }
  0x25   :  { %s3795_s17 = scalar_lea.hbm %s4186_s5, 8192 }
  0x26   :  { %p3796_p2 = scmp.ne.s32.totalorder %s4186_s5, %s3795_s17  ;;  %p3799_p3 = scmp.lt.u32.totalorder %s3795_s17, %s4186_s5 }
  0x28   :  { %p3801_p4 = pnand %p3799_p3, %p3796_p2 }
  0x2a   :  { %3804 = shalt.err (!%p3801_p4)
}
  0x2b   :  { %s3805_s22 = scalar_lea.vmem %s52_s26, 8192  ;;  %p3810_p6 = scmp.lt.s32.totalorder %s52_s26, %s52_s26 }
  0x2c   :  { %p3806_p5 = scmp.ne.s32.totalorder %s52_s26, %s3805_s22  ;;  %p3811_p7 = scmp.lt.s32.totalorder %s3805_s22, %s3805_s22 }
  0x2e   :  { %p3812_p8 = por %p3811_p7, %p3810_p6 }
  0x30   :  { %p3813_p9 = pnand %p3812_p8, %p3806_p5 }
  0x32   :  { %3816 = shalt.err (!%p3813_p9)
}
  0x33   :  { %s3874_s0 = smov 128   ;;  %s3875_s23 = smov 8  }
  0x34   :  { %57 = dma.hbm_to_vmem [thread:$0]  %s4186_s5, 8192, %s52_s26, [#allocation6], %s3874_s0, %s3874_s0, %s3875_s23  }
  0x35   :  { %s3876_s27 = smov [#allocation8]   ;;  %s3817_s11 = scalar_lea.hbm %s4188_s7, 2048 }
  0x36   :  { %s65_s28 = sshll.u32 %s3876_s27, 4  ;;  %p3818_p10 = scmp.ne.s32.totalorder %s4188_s7, %s3817_s11  ;;  %s66_s28 = int_to_ptr.vmem [resolvable:$true] %s65_s28 }
  0x37   :  { %p3821_p11 = scmp.lt.u32.totalorder %s3817_s11, %s4188_s7 }
  0x39   :  { %p3823_p12 = pnand %p3821_p11, %p3818_p10 }
  0x3b   :  { %3826 = shalt.err (!%p3823_p12)
}
  0x3c   :  { %s3827_s14 = scalar_lea.vmem %s66_s28, 2048  ;;  %p3832_p0 = scmp.lt.s32.totalorder %s66_s28, %s66_s28 }
  0x3d   :  { %p3828_p13 = scmp.ne.s32.totalorder %s66_s28, %s3827_s14  ;;  %p3833_p1 = scmp.lt.s32.totalorder %s3827_s14, %s3827_s14 }
  0x3f   :  { %p3834_p2 = por %p3833_p1, %p3832_p0 }
  0x41   :  { %p3835_p3 = pnand %p3834_p2, %p3828_p13 }
  0x43   :  { %3838 = shalt.err (!%p3835_p3)
}
  0x44   :  { %s3877_s5 = smov 64   ;;  %s3878_s26 = smov 4  }
  0x45   :  { %71 = dma.hbm_to_vmem [thread:$0]  %s4188_s7, 2048, %s66_s28, [#allocation9], %s3877_s5, %s3877_s5, %s3878_s26  }
  0x46   :  { %3861 = dma.done.wait [#allocation3], 1024  }
  0x47   :  { %3862 = vsyncadd [#allocation3], 4294966272 }
  0x48   :  { %3863 = dma.done.wait [#allocation6], 40960  }
  0x49   :  { %3864 = vsyncadd [#allocation6], 4294926336 }
  0x4a   :  { %3865 = dma.done.wait [#allocation9], 2048  }
  0x4b   :  { %3866 = vsyncadd [#allocation9], 4294965248  ;;  %v3255_v0 = vld [vmem:[#allocation5 + $0x4] ss:$16 sps:$4 sm:$0xff]   ;;  %v3257_v1 = vld [vmem:[#allocation5] ss:$16 sps:$4 sm:$0xff]  }
  0x4c   :  { %1689 = vmatprep.subr.bf16.mxu1 %v3255_v0  ;;  %v3258_v2 = vld [vmem:[#allocation5 + $0x24] ss:$16 sps:$4 sm:$0xff]   ;;  %v3260_v3 = vld [vmem:[#allocation5 + $0x20] ss:$16 sps:$4 sm:$0xff]   ;;  %v3879_v13 = vmov 0   ;;  %v88_v14 = vld [vmem:[#allocation2 + $0x8] sm:$0xff] }
  0x4d   :  { %1690 = vmatpush1.bf16.msra.mxu1 %v3257_v1  ;;  %v3261_v4 = vld [vmem:[#allocation5 + $0x44] ss:$16 sps:$4 sm:$0xff]   ;;  %v3263_v5 = vld [vmem:[#allocation5 + $0x40] ss:$16 sps:$4 sm:$0xff]   ;;  %3250 = vset.pattern.permute.xlu0 %v3879_v13  ;;  %v3982_v16 = vpack.c.bf16 %v88_v14, %v88_v14  ;;  %v90_v63 = vld [vmem:[#allocation2 + $0x18] sm:$0xff] }
  0x4e   :  { %1691 = vmatprep.subr.bf16.mxu1 %v3258_v2  ;;  %v3264_v6 = vld [vmem:[#allocation5 + $0x64] ss:$16 sps:$4 sm:$0xff]   ;;  %v3266_v7 = vld [vmem:[#allocation5 + $0x60] ss:$16 sps:$4 sm:$0xff]   ;;  %v3987_v0 = vpack.c.bf16 %v90_v63, %v90_v63  ;;  %v92_v2 = vld [vmem:[#allocation2 + $0x28] sm:$0xff] }
  0x4f   :  { %v3267_v8 = vld [vmem:[#allocation5 + $0x84] ss:$16 sps:$4 sm:$0xff]   ;;  %v3269_v9 = vld [vmem:[#allocation5 + $0x80] ss:$16 sps:$4 sm:$0xff]   ;;  %1721 = vmatprep.mubr.bf16.mxu1 %v3982_v16 }
  0x50   :  { %v3270_v10 = vld [vmem:[#allocation5 + $0xa4] ss:$16 sps:$4 sm:$0xff]   ;;  %v3272_v11 = vld [vmem:[#allocation5 + $0xa0] ss:$16 sps:$4 sm:$0xff]  }
  0x51   :  { %1692 = vmatpush1.bf16.msra.mxu1 %v3260_v3  ;;  %v3273_v12 = vld [vmem:[#allocation5 + $0xc4] ss:$16 sps:$4 sm:$0xff]   ;;  %v3275_v15 = vld [vmem:[#allocation5 + $0xc0] ss:$16 sps:$4 sm:$0xff]  }
  0x52   :  { %1693 = vmatprep.subr.bf16.mxu1 %v3261_v4  ;;  %v3276_v17 = vld [vmem:[#allocation5 + $0xe4] ss:$16 sps:$4 sm:$0xff]   ;;  %v3308_v19 = vld [vmem:[#allocation5 + $0x400] ss:$16 sps:$4 sm:$0xff]   ;;  %v3990_v4 = vpack.c.bf16 %v92_v2, %v92_v2 }
  0x53   :  { %v3306_v18 = vld [vmem:[#allocation5 + $0x404] ss:$16 sps:$4 sm:$0xff]   ;;  %v3278_v20 = vld [vmem:[#allocation5 + $0xe0] ss:$16 sps:$4 sm:$0xff]  }
  0x54   :  { %1771 = vmatprep.subr.bf16.mxu0 %v3306_v18  ;;  %v3312_v21 = vld [vmem:[#allocation5 + $0x424] ss:$16 sps:$4 sm:$0xff]   ;;  %v3314_v22 = vld [vmem:[#allocation5 + $0x420] ss:$16 sps:$4 sm:$0xff]   ;;  %1803 = vmatprep.mubr.bf16.mxu0 %v3990_v4 }
  0x55   :  { %1694 = vmatpush1.bf16.msra.mxu1 %v3263_v5  ;;  %1772 = vmatpush1.bf16.msra.mxu0 %v3308_v19  ;;  %v3279_v23 = vld [vmem:[#allocation5 + $0x104] ss:$16 sps:$4 sm:$0xff]   ;;  %v3281_v25 = vld [vmem:[#allocation5 + $0x100] ss:$16 sps:$4 sm:$0xff]  }
  0x56   :  { %1695 = vmatprep.subr.bf16.mxu1 %v3264_v6  ;;  %1773 = vmatprep.subr.bf16.mxu0 %v3312_v21  ;;  %v3318_v24 = vld [vmem:[#allocation5 + $0x444] ss:$16 sps:$4 sm:$0xff]   ;;  %v3320_v26 = vld [vmem:[#allocation5 + $0x440] ss:$16 sps:$4 sm:$0xff]  }
  0x57   :  { %v3282_v27 = vld [vmem:[#allocation5 + $0x124] ss:$16 sps:$4 sm:$0xff]   ;;  %v3284_v29 = vld [vmem:[#allocation5 + $0x120] ss:$16 sps:$4 sm:$0xff]  }
  0x58   :  { %v3324_v28 = vld [vmem:[#allocation5 + $0x464] ss:$16 sps:$4 sm:$0xff]   ;;  %v3326_v30 = vld [vmem:[#allocation5 + $0x460] ss:$16 sps:$4 sm:$0xff]  }
  0x59   :  { %1696 = vmatpush1.bf16.msra.mxu1 %v3266_v7  ;;  %1774 = vmatpush1.bf16.msra.mxu0 %v3314_v22  ;;  %v3285_v31 = vld [vmem:[#allocation5 + $0x144] ss:$16 sps:$4 sm:$0xff]   ;;  %v3287_v33 = vld [vmem:[#allocation5 + $0x140] ss:$16 sps:$4 sm:$0xff]  }
  0x5a   :  { %1697 = vmatprep.subr.bf16.mxu1 %v3267_v8  ;;  %1775 = vmatprep.subr.bf16.mxu0 %v3318_v24  ;;  %v3330_v32 = vld [vmem:[#allocation5 + $0x484] ss:$16 sps:$4 sm:$0xff]   ;;  %v3332_v34 = vld [vmem:[#allocation5 + $0x480] ss:$16 sps:$4 sm:$0xff]  }
  0x5b   :  { %v3288_v35 = vld [vmem:[#allocation5 + $0x164] ss:$16 sps:$4 sm:$0xff]   ;;  %v3290_v37 = vld [vmem:[#allocation5 + $0x160] ss:$16 sps:$4 sm:$0xff]  }
  0x5c   :  { %v3336_v36 = vld [vmem:[#allocation5 + $0x4a4] ss:$16 sps:$4 sm:$0xff]   ;;  %v3338_v38 = vld [vmem:[#allocation5 + $0x4a0] ss:$16 sps:$4 sm:$0xff]  }
  0x5d   :  { %1698 = vmatpush1.bf16.msra.mxu1 %v3269_v9  ;;  %1776 = vmatpush1.bf16.msra.mxu0 %v3320_v26  ;;  %v3291_v39 = vld [vmem:[#allocation5 + $0x184] ss:$16 sps:$4 sm:$0xff]   ;;  %v3293_v41 = vld [vmem:[#allocation5 + $0x180] ss:$16 sps:$4 sm:$0xff]  }
  0x5e   :  { %1699 = vmatprep.subr.bf16.mxu1 %v3270_v10  ;;  %1777 = vmatprep.subr.bf16.mxu0 %v3324_v28  ;;  %v3342_v40 = vld [vmem:[#allocation5 + $0x4c4] ss:$16 sps:$4 sm:$0xff]   ;;  %v3344_v42 = vld [vmem:[#allocation5 + $0x4c0] ss:$16 sps:$4 sm:$0xff]   ;;  %v3402_v28 = vld [vmem:[#allocation5 + $0x8] ss:$16 sps:$4 sm:$0xff]  }
  0x5f   :  { %v3294_v43 = vld [vmem:[#allocation5 + $0x1a4] ss:$16 sps:$4 sm:$0xff]   ;;  %v3296_v45 = vld [vmem:[#allocation5 + $0x1a0] ss:$16 sps:$4 sm:$0xff]  }
  0x60   :  { %v3348_v44 = vld [vmem:[#allocation5 + $0x4e4] ss:$16 sps:$4 sm:$0xff]   ;;  %v3350_v46 = vld [vmem:[#allocation5 + $0x4e0] ss:$16 sps:$4 sm:$0xff]  }
  0x61   :  { %1700 = vmatpush1.bf16.msra.mxu1 %v3272_v11  ;;  %1778 = vmatpush1.bf16.msra.mxu0 %v3326_v30  ;;  %v3297_v47 = vld [vmem:[#allocation5 + $0x1c4] ss:$16 sps:$4 sm:$0xff]   ;;  %v3299_v49 = vld [vmem:[#allocation5 + $0x1c0] ss:$16 sps:$4 sm:$0xff]   ;;  %v3410_v30 = vld [vmem:[#allocation5 + $0x2c] ss:$16 sps:$4 sm:$0xff]  }
  0x62   :  { %1701 = vmatprep.subr.bf16.mxu1 %v3273_v12  ;;  %1779 = vmatprep.subr.bf16.mxu0 %v3330_v32  ;;  %v3354_v48 = vld [vmem:[#allocation5 + $0x504] ss:$16 sps:$4 sm:$0xff]   ;;  %v3356_v50 = vld [vmem:[#allocation5 + $0x500] ss:$16 sps:$4 sm:$0xff]   ;;  %v3408_v32 = vld [vmem:[#allocation5 + $0x28] ss:$16 sps:$4 sm:$0xff]  }
  0x63   :  { %v3300_v51 = vld [vmem:[#allocation5 + $0x1e4] ss:$16 sps:$4 sm:$0xff]   ;;  %v3302_v53 = vld [vmem:[#allocation5 + $0x1e0] ss:$16 sps:$4 sm:$0xff]  }
  0x64   :  { %v3360_v52 = vld [vmem:[#allocation5 + $0x524] ss:$16 sps:$4 sm:$0xff]   ;;  %v3362_v55 = vld [vmem:[#allocation5 + $0x520] ss:$16 sps:$4 sm:$0xff]  }
  0x65   :  { %1702 = vmatpush1.bf16.msra.mxu1 %v3275_v15  ;;  %1780 = vmatpush1.bf16.msra.mxu0 %v3332_v34  ;;  %v87_v54 = vld [vmem:[#allocation2] sm:$0xff]  ;;  %v3416_v34 = vld [vmem:[#allocation5 + $0x4c] ss:$16 sps:$4 sm:$0xff]  }
  0x66   :  { %1703 = vmatprep.subr.bf16.mxu1 %v3276_v17  ;;  %1781 = vmatprep.subr.bf16.mxu0 %v3336_v36  ;;  %v3305_v56 = vld [vmem:[#allocation5 + $0x204] ss:$16 sps:$4 sm:$0xff]   ;;  %v3985_v58 = vpack.c.bf16 %v87_v54, %v87_v54  ;;  %v3303_v59 = vld [vmem:[#allocation5 + $0x200] ss:$16 sps:$4 sm:$0xff]   ;;  %v3414_v36 = vld [vmem:[#allocation5 + $0x48] ss:$16 sps:$4 sm:$0xff]  }
  0x67   :  { %v3366_v57 = vld [vmem:[#allocation5 + $0x544] ss:$16 sps:$4 sm:$0xff]   ;;  %v3368_v60 = vld [vmem:[#allocation5 + $0x540] ss:$16 sps:$4 sm:$0xff]  }
  0x68   :  { %v3311_v61 = vld [vmem:[#allocation5 + $0x224] ss:$16 sps:$4 sm:$0xff]   ;;  %v3309_v1 = vld [vmem:[#allocation5 + $0x220] ss:$16 sps:$4 sm:$0xff]  }
  0x69   :  { %1704 = vmatpush1.bf16.msra.mxu1 %v3278_v20  ;;  %1782 = vmatpush1.bf16.msra.mxu0 %v3338_v38  ;;  %v3372_v62 = vld [vmem:[#allocation5 + $0x564] ss:$16 sps:$4 sm:$0xff]   ;;  %v3374_v3 = vld [vmem:[#allocation5 + $0x560] ss:$16 sps:$4 sm:$0xff]   ;;  %v3422_v38 = vld [vmem:[#allocation5 + $0x6c] ss:$16 sps:$4 sm:$0xff]  }
  0x6a   :  { %1705 = vmatprep.subr.bf16.mxu1 %v3279_v23  ;;  %1783 = vmatprep.subr.bf16.mxu0 %v3342_v40  ;;  %v3317_v5 = vld [vmem:[#allocation5 + $0x244] ss:$16 sps:$4 sm:$0xff]   ;;  %v3315_v7 = vld [vmem:[#allocation5 + $0x240] ss:$16 sps:$4 sm:$0xff]   ;;  %v3420_v40 = vld [vmem:[#allocation5 + $0x68] ss:$16 sps:$4 sm:$0xff]  }
  0x6b   :  { %v3378_v6 = vld [vmem:[#allocation5 + $0x584] ss:$16 sps:$4 sm:$0xff]   ;;  %v3380_v8 = vld [vmem:[#allocation5 + $0x580] ss:$16 sps:$4 sm:$0xff]  }
  0x6c   :  { %v3323_v9 = vld [vmem:[#allocation5 + $0x264] ss:$16 sps:$4 sm:$0xff]   ;;  %v3321_v11 = vld [vmem:[#allocation5 + $0x260] ss:$16 sps:$4 sm:$0xff]  }
  0x6d   :  { %1706 = vmatpush1.bf16.msra.mxu1 %v3281_v25  ;;  %1784 = vmatpush1.bf16.msra.mxu0 %v3344_v42  ;;  %v3384_v10 = vld [vmem:[#allocation5 + $0x5a4] ss:$16 sps:$4 sm:$0xff]   ;;  %v3386_v12 = vld [vmem:[#allocation5 + $0x5a0] ss:$16 sps:$4 sm:$0xff]   ;;  %v3404_v25 = vld [vmem:[#allocation5 + $0xc] ss:$16 sps:$4 sm:$0xff]  }
  0x6e   :  { %1707 = vmatprep.subr.bf16.mxu1 %v3282_v27  ;;  %1785 = vmatprep.subr.bf16.mxu0 %v3348_v44  ;;  %v3329_v13 = vld [vmem:[#allocation5 + $0x284] ss:$16 sps:$4 sm:$0xff]   ;;  %v3327_v15 = vld [vmem:[#allocation5 + $0x280] ss:$16 sps:$4 sm:$0xff]   ;;  %v3428_v42 = vld [vmem:[#allocation5 + $0x8c] ss:$16 sps:$4 sm:$0xff]  }
  0x6f   :  { %v3390_v14 = vld [vmem:[#allocation5 + $0x5c4] ss:$16 sps:$4 sm:$0xff]   ;;  %v3392_v17 = vld [vmem:[#allocation5 + $0x5c0] ss:$16 sps:$4 sm:$0xff]  }
  0x70   :  { %v3997_v18 = vld [vmem:[%s4182_s1] sm:$0xff] }
  0x71   :  { %1708 = vmatpush1.bf16.msra.mxu1 %v3284_v29  ;;  %1786 = vmatpush1.bf16.msra.mxu0 %v3350_v46  ;;  %v3335_v19 = vld [vmem:[#allocation5 + $0x2a4] ss:$16 sps:$4 sm:$0xff]   ;;  %v3333_v21 = vld [vmem:[#allocation5 + $0x2a0] ss:$16 sps:$4 sm:$0xff]  }
  0x72   :  { %1709 = vmatprep.subr.bf16.mxu1 %v3285_v31  ;;  %1787 = vmatprep.subr.bf16.mxu0 %v3354_v48  ;;  %v3396_v20 = vld [vmem:[#allocation5 + $0x5e4] ss:$16 sps:$4 sm:$0xff]   ;;  %v3398_v22 = vld [vmem:[#allocation5 + $0x5e0] ss:$16 sps:$4 sm:$0xff]  }
  0x73   :  { %364 = vperm.xlu0 %3250, %v3997_v18   ;;  %v91_v23 = vld [vmem:[#allocation2 + $0x20] sm:$0xff] }
  0x74   :  { %v3341_v24 = vld [vmem:[#allocation5 + $0x2c4] ss:$16 sps:$4 sm:$0xff]   ;;  %v4000_v26 = vpack.c.bf16 %v91_v23, %v91_v23  ;;  %v3339_v27 = vld [vmem:[#allocation5 + $0x2c0] ss:$16 sps:$4 sm:$0xff]  }
  0x75   :  { %1710 = vmatpush1.bf16.msra.mxu1 %v3287_v33  ;;  %1788 = vmatpush1.bf16.msra.mxu0 %v3356_v50  ;;  %v3347_v29 = vld [vmem:[#allocation5 + $0x2e4] ss:$16 sps:$4 sm:$0xff]   ;;  %v3345_v31 = vld [vmem:[#allocation5 + $0x2e0] ss:$16 sps:$4 sm:$0xff]  }
  0x76   :  { %1711 = vmatprep.subr.bf16.mxu1 %v3288_v35  ;;  %1789 = vmatprep.subr.bf16.mxu0 %v3360_v52  ;;  %v3353_v33 = vld [vmem:[#allocation5 + $0x304] ss:$16 sps:$4 sm:$0xff]   ;;  %v3351_v35 = vld [vmem:[#allocation5 + $0x300] ss:$16 sps:$4 sm:$0xff]   ;;  %v3438_v52 = vld [vmem:[#allocation5 + $0xc8] ss:$16 sps:$4 sm:$0xff]  }
  0x77   :  { %v3371_v44 = vld [vmem:[#allocation5 + $0x364] ss:$16 sps:$4 sm:$0xff]   ;;  %v3369_v46 = vld [vmem:[#allocation5 + $0x360] ss:$16 sps:$4 sm:$0xff]  }
  0x78   :  { %v3377_v48 = vld [vmem:[#allocation5 + $0x384] ss:$16 sps:$4 sm:$0xff]   ;;  %v3375_v50 = vld [vmem:[#allocation5 + $0x380] ss:$16 sps:$4 sm:$0xff]  }
  0x79   :  { %1712 = vmatpush1.bf16.msra.mxu1 %v3290_v37  ;;  %1790 = vmatpush1.bf16.msra.mxu0 %v3362_v55  ;;  %v3359_v37 = vld [vmem:[#allocation5 + $0x324] ss:$16 sps:$4 sm:$0xff]   ;;  %v3381_v54 = vld [vmem:[#allocation5 + $0x3a0] ss:$16 sps:$4 sm:$0xff]  }
  0x7a   :  { %1713 = vmatprep.subr.bf16.mxu1 %v3291_v39  ;;  %1791 = vmatprep.subr.bf16.mxu0 %v3366_v57  ;;  %v3357_v39 = vld [vmem:[#allocation5 + $0x320] ss:$16 sps:$4 sm:$0xff]   ;;  %v3389_v55 = vld [vmem:[#allocation5 + $0x3c4] ss:$16 sps:$4 sm:$0xff]   ;;  %v3452_v57 = vld [vmem:[#allocation5 + $0x10c] ss:$16 sps:$4 sm:$0xff]  }
  0x7b   :  { %v3393_v63 = vld [vmem:[#allocation5 + $0x3e0] ss:$16 sps:$4 sm:$0xff]   ;;  %v3401_v2 = vld [vmem:[#allocation5 + $0x604] ss:$16 sps:$4 sm:$0xff]  }
  0x7c   :  { %v3417_v23 = vld [vmem:[#allocation5 + $0x660] ss:$16 sps:$4 sm:$0xff]  }
  0x7d   :  { %1714 = vmatpush1.bf16.msra.mxu1 %v3293_v41  ;;  %1792 = vmatpush1.bf16.msra.mxu0 %v3368_v60  ;;  %v3365_v41 = vld [vmem:[#allocation5 + $0x344] ss:$16 sps:$4 sm:$0xff]  }
  0x7e   :  { %1715 = vmatprep.subr.bf16.mxu1 %v3294_v43  ;;  %1793 = vmatprep.subr.bf16.mxu0 %v3372_v62  ;;  %v3363_v43 = vld [vmem:[#allocation5 + $0x340] ss:$16 sps:$4 sm:$0xff]   ;;  %v3395_v60 = vld [vmem:[#allocation5 + $0x3e4] ss:$16 sps:$4 sm:$0xff]   ;;  %v3458_v62 = vld [vmem:[#allocation5 + $0x12c] ss:$16 sps:$4 sm:$0xff]  }
  0x81   :  { %1716 = vmatpush1.bf16.msra.mxu1 %v3296_v45  ;;  %1794 = vmatpush1.bf16.msra.mxu0 %v3374_v3  ;;  %v3434_v45 = vld [vmem:[#allocation5 + $0xac] ss:$16 sps:$4 sm:$0xff]   ;;  %v3456_v3 = vld [vmem:[#allocation5 + $0x128] ss:$16 sps:$4 sm:$0xff]  }
  0x82   :  { %1717 = vmatprep.subr.bf16.mxu1 %v3297_v47  ;;  %1795 = vmatprep.subr.bf16.mxu0 %v3378_v6  ;;  %v3432_v47 = vld [vmem:[#allocation5 + $0xa8] ss:$16 sps:$4 sm:$0xff]   ;;  %v3399_v6 = vld [vmem:[#allocation5 + $0x600] ss:$16 sps:$4 sm:$0xff]  }
  0x85   :  { %1718 = vmatpush1.bf16.msra.mxu1 %v3299_v49  ;;  %1796 = vmatpush1.bf16.msra.mxu0 %v3380_v8  ;;  %v3440_v49 = vld [vmem:[#allocation5 + $0xcc] ss:$16 sps:$4 sm:$0xff]   ;;  %v3407_v8 = vld [vmem:[#allocation5 + $0x624] ss:$16 sps:$4 sm:$0xff]  }
  0x86   :  { %1719 = vmatprep.subr.bf16.mxu1 %v3300_v51  ;;  %1797 = vmatprep.subr.bf16.mxu0 %v3384_v10  ;;  %v3383_v51 = vld [vmem:[#allocation5 + $0x3a4] ss:$16 sps:$4 sm:$0xff]   ;;  %v3462_v10 = vld [vmem:[#allocation5 + $0x148] ss:$16 sps:$4 sm:$0xff]  }
  0x89   :  { %1720 = vmatpush1.bf16.msra.mxu1 %v3302_v53  ;;  %1798 = vmatpush1.bf16.msra.mxu0 %v3386_v12  ;;  %v3446_v53 = vld [vmem:[#allocation5 + $0xec] ss:$16 sps:$4 sm:$0xff]  }
  0x8a   :  { %1730 = vmatprep.subr.bf16.mxu1 %v3305_v56  ;;  %1799 = vmatprep.subr.bf16.mxu0 %v3390_v14  ;;  %v3444_v56 = vld [vmem:[#allocation5 + $0xe8] ss:$16 sps:$4 sm:$0xff]   ;;  %v3413_v14 = vld [vmem:[#allocation5 + $0x644] ss:$16 sps:$4 sm:$0xff]  }
  0x8c   :  { %1722 = vmatmul.mubr.bf16.vlgmr.msra.gmra.mrb[0].mxu1 %v3985_v58 }
  0x8d   :  { %1731 = vmatpush1.bf16.msra.mxu1 %v3303_v59  ;;  %1762 = vmatprep.mubr.bf16.mxu1 %v3987_v0  ;;  %v3387_v59 = vld [vmem:[#allocation5 + $0x3c0] ss:$16 sps:$4 sm:$0xff]  }
  0x8e   :  { %1732 = vmatprep.subr.bf16.mxu1 %v3311_v61  ;;  %1800 = vmatpush1.bf16.msra.mxu0 %v3392_v17  ;;  %v3450_v61 = vld [vmem:[#allocation5 + $0x108] ss:$16 sps:$4 sm:$0xff]   ;;  %v3476_v17 = vld [vmem:[#allocation5 + $0x18c] ss:$16 sps:$4 sm:$0xff]  }
  0x8f   :  { %1801 = vmatprep.subr.bf16.mxu0 %v3396_v20  ;;  %v3419_v20 = vld [vmem:[#allocation5 + $0x664] ss:$16 sps:$4 sm:$0xff]  }
  0x91   :  { %1733 = vmatpush1.bf16.msra.mxu1 %v3309_v1  ;;  %v89_v1 = vld [vmem:[#allocation2 + $0x10] sm:$0xff] }
  0x92   :  { %1734 = vmatprep.subr.bf16.mxu1 %v3317_v5  ;;  %1802 = vmatpush1.bf16.msra.mxu0 %v3398_v22  ;;  %v3464_v5 = vld [vmem:[#allocation5 + $0x14c] ss:$16 sps:$4 sm:$0xff]  }
  0x93   :  { %1853 = vmatprep.subr.bf16.mxu0 %v3404_v25  ;;  %v3482_v22 = vld [vmem:[#allocation5 + $0x1ac] ss:$16 sps:$4 sm:$0xff]   ;;  %v3480_v25 = vld [vmem:[#allocation5 + $0x1a8] ss:$16 sps:$4 sm:$0xff]  }
  0x95   :  { %1735 = vmatpush1.bf16.msra.mxu1 %v3315_v7  ;;  %1804 = vmatmul.mubr.bf16.vlgmr.msra.gmra.mrb[0].mxu0 %v4000_v26  ;;  %v4004_v7 = vpack.c.bf16 %v89_v1, %v89_v1  ;;  %v3477_v1 = vld [vmem:[#allocation5 + $0x7a0] ss:$16 sps:$4 sm:$0xff]  }
  0x96   :  { %1736 = vmatprep.subr.bf16.mxu1 %v3323_v9  ;;  %1854 = vmatpush1.bf16.msra.mxu0 %v3402_v28  ;;  %v94_v9 = vld [vmem:[#allocation2 + $0x38] sm:$0xff]  ;;  %v3423_v28 = vld [vmem:[#allocation5 + $0x680] ss:$16 sps:$4 sm:$0xff]  }
  0x97   :  { %1855 = vmatprep.subr.bf16.mxu0 %v3410_v30  ;;  %1885 = vmatprep.mubr.bf16.mxu0 %v3982_v16  ;;  %v3426_v16 = vld [vmem:[#allocation5 + $0x88] ss:$16 sps:$4 sm:$0xff]   ;;  %v4006_v12 = vpack.c.bf16 %v94_v9, %v94_v9 }
  0x98   :  { %v3486_v30 = vld [vmem:[#allocation5 + $0x1c8] ss:$16 sps:$4 sm:$0xff]  }
  0x99   :  { %1737 = vmatpush1.bf16.msra.mxu1 %v3321_v11  ;;  %v3470_v11 = vld [vmem:[#allocation5 + $0x16c] ss:$16 sps:$4 sm:$0xff]   ;;  %v3546_v9 = vld [vmem:[#allocation5 + $0x508] ss:$16 sps:$4 sm:$0xff]  }
  0x9a   :  { %1738 = vmatprep.subr.bf16.mxu1 %v3329_v13  ;;  %1856 = vmatpush1.bf16.msra.mxu0 %v3408_v32  ;;  %v3405_v13 = vld [vmem:[#allocation5 + $0x620] ss:$16 sps:$4 sm:$0xff]  }
  0x9b   :  { %1857 = vmatprep.subr.bf16.mxu0 %v3416_v34  ;;  %v3429_v32 = vld [vmem:[#allocation5 + $0x6a0] ss:$16 sps:$4 sm:$0xff]   ;;  %v3492_v34 = vld [vmem:[#allocation5 + $0x1e8] ss:$16 sps:$4 sm:$0xff]  }
  0x9d   :  { %1739 = vmatpush1.bf16.msra.mxu1 %v3327_v15  ;;  %v3468_v15 = vld [vmem:[#allocation5 + $0x168] ss:$16 sps:$4 sm:$0xff]  }
  0x9e   :  { %1740 = vmatprep.subr.bf16.mxu1 %v3335_v19  ;;  %1858 = vmatpush1.bf16.msra.mxu0 %v3414_v36  ;;  %v3411_v19 = vld [vmem:[#allocation5 + $0x640] ss:$16 sps:$4 sm:$0xff]   ;;  %v3880_v36 = vmov 2  }
  0x9f   :  { %1859 = vmatprep.subr.bf16.mxu0 %v3422_v38  ;;  %3252 = vset.pattern.permute.xlu1 %v3880_v36  ;;  %v3435_v38 = vld [vmem:[#allocation5 + $0x6c0] ss:$16 sps:$4 sm:$0xff]   ;;  %v3584_v36 = vld [vmem:[#allocation5 + $0x5cc] ss:$16 sps:$4 sm:$0xff]  }
  0xa0   :  { %2066 = vperm.xlu1 %3252, %v3997_v18  }
  0xa1   :  { %1741 = vmatpush1.bf16.msra.mxu1 %v3333_v21  ;;  %v3474_v21 = vld [vmem:[#allocation5 + $0x188] ss:$16 sps:$4 sm:$0xff]  }
  0xa2   :  { %1742 = vmatprep.subr.bf16.mxu1 %v3341_v24  ;;  %1860 = vmatpush1.bf16.msra.mxu0 %v3420_v40  ;;  %v3425_v24 = vld [vmem:[#allocation5 + $0x684] ss:$16 sps:$4 sm:$0xff]   ;;  %v3498_v40 = vld [vmem:[#allocation5 + $0x408] ss:$16 sps:$4 sm:$0xff]  }
  0xa3   :  { %1861 = vmatprep.subr.bf16.mxu0 %v3428_v42  ;;  %v3441_v42 = vld [vmem:[#allocation5 + $0x6e0] ss:$16 sps:$4 sm:$0xff]  }
  0xa5   :  { %1743 = vmatpush1.bf16.msra.mxu1 %v3339_v27  ;;  %v3488_v27 = vld [vmem:[#allocation5 + $0x1cc] ss:$16 sps:$4 sm:$0xff]  }
  0xa6   :  { %1744 = vmatprep.subr.bf16.mxu1 %v3347_v29  ;;  %1862 = vmatpush1.bf16.msra.mxu0 %v3426_v16  ;;  %v3431_v29 = vld [vmem:[#allocation5 + $0x6a4] ss:$16 sps:$4 sm:$0xff]   ;;  %v3882_v16 = vmov 3  }
  0xa7   :  { %1863 = vmatprep.subr.bf16.mxu0 %v3434_v45  ;;  %3253 = vset.pattern.permute.xlu1 %v3882_v16  ;;  %v3512_v45 = vld [vmem:[#allocation5 + $0x44c] ss:$16 sps:$4 sm:$0xff]  }
  0xa8   :  { %2114 = vperm.xlu1 %3253, %v3997_v18  }
  0xa9   :  { %1745 = vmatpush1.bf16.msra.mxu1 %v3345_v31  ;;  %v3494_v31 = vld [vmem:[#allocation5 + $0x1ec] ss:$16 sps:$4 sm:$0xff]  }
  0xaa   :  { %1746 = vmatprep.subr.bf16.mxu1 %v3353_v33  ;;  %1864 = vmatpush1.bf16.msra.mxu0 %v3432_v47  ;;  %v3437_v33 = vld [vmem:[#allocation5 + $0x6c4] ss:$16 sps:$4 sm:$0xff]   ;;  %v3510_v47 = vld [vmem:[#allocation5 + $0x448] ss:$16 sps:$4 sm:$0xff]  }
  0xab   :  { %1865 = vmatprep.subr.bf16.mxu0 %v3440_v49  ;;  %v3453_v49 = vld [vmem:[#allocation5 + $0x720] ss:$16 sps:$4 sm:$0xff]  }
  0xad   :  { %1747 = vmatpush1.bf16.msra.mxu1 %v3351_v35  ;;  %v3500_v35 = vld [vmem:[#allocation5 + $0x40c] ss:$16 sps:$4 sm:$0xff]  }
  0xae   :  { %1748 = vmatprep.subr.bf16.mxu1 %v3359_v37  ;;  %1866 = vmatpush1.bf16.msra.mxu0 %v3438_v52  ;;  %v3881_v37 = vmov 1   ;;  %v3524_v52 = vld [vmem:[#allocation5 + $0x48c] ss:$16 sps:$4 sm:$0xff]  }
  0xaf   :  { %1867 = vmatprep.subr.bf16.mxu0 %v3446_v53  ;;  %3251 = vset.pattern.permute.xlu0 %v3881_v37  ;;  %v3467_v53 = vld [vmem:[#allocation5 + $0x764] ss:$16 sps:$4 sm:$0xff]   ;;  %v3519_v37 = vld [vmem:[#allocation5 + $0x288] ss:$16 sps:$4 sm:$0xff]  }
  0xb0   :  { %2018 = vperm.xlu0 %3251, %v3997_v18   ;;  %v3522_v18 = vld [vmem:[#allocation5 + $0x488] ss:$16 sps:$4 sm:$0xff]  }
  0xb1   :  { %1749 = vmatpush1.bf16.msra.mxu1 %v3357_v39  ;;  %v3443_v39 = vld [vmem:[#allocation5 + $0x6e4] ss:$16 sps:$4 sm:$0xff]  }
  0xb2   :  { %1750 = vmatprep.subr.bf16.mxu1 %v3365_v41  ;;  %1868 = vmatpush1.bf16.msra.mxu0 %v3444_v56  ;;  %v3506_v41 = vld [vmem:[#allocation5 + $0x42c] ss:$16 sps:$4 sm:$0xff]   ;;  %v3473_v56 = vld [vmem:[#allocation5 + $0x784] ss:$16 sps:$4 sm:$0xff]  }
  0xb3   :  { %1869 = vmatprep.subr.bf16.mxu0 %v3452_v57  ;;  %v3528_v57 = vld [vmem:[#allocation5 + $0x4a8] ss:$16 sps:$4 sm:$0xff]  }
  0xb4   :  { %3254 = vset.pattern.permute.xlu0 %v3882_v16  ;;  %v3539_v16 = vld [vmem:[#allocation5 + $0x2ec] ss:$16 sps:$4 sm:$0xff]  }
  0xb5   :  { %1751 = vmatpush1.bf16.msra.mxu1 %v3363_v43  ;;  %v3449_v43 = vld [vmem:[#allocation5 + $0x704] ss:$16 sps:$4 sm:$0xff]  }
  0xb6   :  { %1752 = vmatprep.subr.bf16.mxu1 %v3371_v44  ;;  %1870 = vmatpush1.bf16.msra.mxu0 %v3450_v61  ;;  %v3504_v44 = vld [vmem:[#allocation5 + $0x428] ss:$16 sps:$4 sm:$0xff]   ;;  %v3479_v61 = vld [vmem:[#allocation5 + $0x7a4] ss:$16 sps:$4 sm:$0xff]  }
  0xb7   :  { %1871 = vmatprep.subr.bf16.mxu0 %v3458_v62  ;;  %v3534_v62 = vld [vmem:[#allocation5 + $0x4c8] ss:$16 sps:$4 sm:$0xff]  }
  0xb9   :  { %1753 = vmatpush1.bf16.msra.mxu1 %v3369_v46  ;;  %v3447_v46 = vld [vmem:[#allocation5 + $0x700] ss:$16 sps:$4 sm:$0xff]  }
  0xba   :  { %1754 = vmatprep.subr.bf16.mxu1 %v3377_v48  ;;  %1872 = vmatpush1.bf16.msra.mxu0 %v3456_v3  ;;  %v3455_v48 = vld [vmem:[#allocation5 + $0x724] ss:$16 sps:$4 sm:$0xff]   ;;  %v3540_v3 = vld [vmem:[#allocation5 + $0x4e8] ss:$16 sps:$4 sm:$0xff]  }
  0xbb   :  { %1873 = vmatprep.subr.bf16.mxu0 %v3464_v5  ;;  %v3548_v5 = vld [vmem:[#allocation5 + $0x50c] ss:$16 sps:$4 sm:$0xff]  }
  0xbd   :  { %1755 = vmatpush1.bf16.msra.mxu1 %v3375_v50  ;;  %v3516_v50 = vld [vmem:[#allocation5 + $0x468] ss:$16 sps:$4 sm:$0xff]  }
  0xbe   :  { %1756 = vmatprep.subr.bf16.mxu1 %v3383_v51  ;;  %1874 = vmatpush1.bf16.msra.mxu0 %v3462_v10  ;;  %v3461_v51 = vld [vmem:[#allocation5 + $0x744] ss:$16 sps:$4 sm:$0xff]   ;;  %v3554_v10 = vld [vmem:[#allocation5 + $0x52c] ss:$16 sps:$4 sm:$0xff]  }
  0xbf   :  { %1875 = vmatprep.subr.bf16.mxu0 %v3470_v11  ;;  %v3489_v11 = vld [vmem:[#allocation5 + $0x7e0] ss:$16 sps:$4 sm:$0xff]  }
  0xc1   :  { %1757 = vmatpush1.bf16.msra.mxu1 %v3381_v54  ;;  %v3530_v54 = vld [vmem:[#allocation5 + $0x4ac] ss:$16 sps:$4 sm:$0xff]  }
  0xc2   :  { %1758 = vmatprep.subr.bf16.mxu1 %v3389_v55  ;;  %1876 = vmatpush1.bf16.msra.mxu0 %v3468_v15  ;;  %v3465_v55 = vld [vmem:[#allocation5 + $0x760] ss:$16 sps:$4 sm:$0xff]   ;;  %v3552_v15 = vld [vmem:[#allocation5 + $0x528] ss:$16 sps:$4 sm:$0xff]  }
  0xc3   :  { %1877 = vmatprep.subr.bf16.mxu0 %v3476_v17  ;;  %v3560_v17 = vld [vmem:[#allocation5 + $0x54c] ss:$16 sps:$4 sm:$0xff]  }
  0xc5   :  { %1759 = vmatpush1.bf16.msra.mxu1 %v3387_v59  ;;  %v3536_v59 = vld [vmem:[#allocation5 + $0x4cc] ss:$16 sps:$4 sm:$0xff]  }
  0xc6   :  { %1760 = vmatprep.subr.bf16.mxu1 %v3395_v60  ;;  %1878 = vmatpush1.bf16.msra.mxu0 %v3474_v21  ;;  %v3471_v60 = vld [vmem:[#allocation5 + $0x780] ss:$16 sps:$4 sm:$0xff]  }
  0xc7   :  { %1879 = vmatprep.subr.bf16.mxu0 %v3482_v22  ;;  %v3503_v22 = vld [vmem:[#allocation5 + $0x22c] ss:$16 sps:$4 sm:$0xff]  }
  0xc9   :  { %1761 = vmatpush1.bf16.msra.mxu1 %v3393_v63  ;;  %v3542_v63 = vld [vmem:[#allocation5 + $0x4ec] ss:$16 sps:$4 sm:$0xff]  }
  0xca   :  { %1812 = vmatprep.subr.bf16.mxu1 %v3401_v2  ;;  %1880 = vmatpush1.bf16.msra.mxu0 %v3480_v25  ;;  %v3485_v2 = vld [vmem:[#allocation5 + $0x7c4] ss:$16 sps:$4 sm:$0xff]   ;;  %v3564_v25 = vld [vmem:[#allocation5 + $0x568] ss:$16 sps:$4 sm:$0xff]  }
  0xcb   :  { %1881 = vmatprep.subr.bf16.mxu0 %v3488_v27  ;;  %v3509_v27 = vld [vmem:[#allocation5 + $0x24c] ss:$16 sps:$4 sm:$0xff]  }
  0xcc   :  { %1763 = vmatmul.mubr.bf16.vlgmr.msra.gmra.mrb[4].mxu1 %v4004_v7 }
  0xcd   :  { %1813 = vmatpush1.bf16.msra.mxu1 %v3399_v6  ;;  %1844 = vmatprep.mubr.bf16.mxu1 %v4006_v12  ;;  %v3483_v6 = vld [vmem:[#allocation5 + $0x7c0] ss:$16 sps:$4 sm:$0xff]  }
  0xce   :  { %1814 = vmatprep.subr.bf16.mxu1 %v3407_v8  ;;  %1882 = vmatpush1.bf16.msra.mxu0 %v3486_v30  ;;  %v3491_v8 = vld [vmem:[#allocation5 + $0x7e4] ss:$16 sps:$4 sm:$0xff]   ;;  %v3570_v30 = vld [vmem:[#allocation5 + $0x588] ss:$16 sps:$4 sm:$0xff]  }
  0xcf   :  { %1883 = vmatprep.subr.bf16.mxu0 %v3494_v31  ;;  %v3515_v31 = vld [vmem:[#allocation5 + $0x26c] ss:$16 sps:$4 sm:$0xff]  }
  0xd1   :  { %1815 = vmatpush1.bf16.msra.mxu1 %v3405_v13  ;;  %v93_v13 = vld [vmem:[#allocation2 + $0x30] sm:$0xff] }
  0xd2   :  { %1816 = vmatprep.subr.bf16.mxu1 %v3413_v14  ;;  %1884 = vmatpush1.bf16.msra.mxu0 %v3492_v34  ;;  %v3497_v14 = vld [vmem:[#allocation5 + $0x20c] ss:$16 sps:$4 sm:$0xff]   ;;  %v4015_v21 = vpack.c.bf16 %v93_v13, %v93_v13  ;;  %v3576_v34 = vld [vmem:[#allocation5 + $0x5a8] ss:$16 sps:$4 sm:$0xff]  }
  0xd3   :  { %1935 = vmatprep.subr.bf16.mxu0 %v3500_v35  ;;  %v3521_v35 = vld [vmem:[#allocation5 + $0x28c] ss:$16 sps:$4 sm:$0xff]  }
  0xd4   :  { %v3587_v13 = vld [vmem:[#allocation5 + $0x3ec] ss:$16 sps:$4 sm:$0xff]  }
  0xd5   :  { %1817 = vmatpush1.bf16.msra.mxu1 %v3411_v19  ;;  %1886 = vmatmul.mubr.bf16.vlgmr.msra.gmra.mrb[4].mxu0 %v3985_v58  ;;  %v3518_v58 = vld [vmem:[#allocation5 + $0x46c] ss:$16 sps:$4 sm:$0xff]   ;;  %v3495_v19 = vld [vmem:[#allocation5 + $0x208] ss:$16 sps:$4 sm:$0xff]  }
  0xd6   :  { %1818 = vmatprep.subr.bf16.mxu1 %v3419_v20  ;;  %1936 = vmatpush1.bf16.msra.mxu0 %v3498_v40  ;;  %v3558_v20 = vld [vmem:[#allocation5 + $0x548] ss:$16 sps:$4 sm:$0xff]  }
  0xd7   :  { %1937 = vmatprep.subr.bf16.mxu0 %v3506_v41  ;;  %1967 = vmatprep.mubr.bf16.mxu0 %v3990_v4  ;;  %v3459_v4 = vld [vmem:[#allocation5 + $0x740] ss:$16 sps:$4 sm:$0xff]   ;;  %v3525_v40 = vld [vmem:[#allocation5 + $0x2a8] ss:$16 sps:$4 sm:$0xff]  }
  0xd8   :  { %v3588_v41 = vld [vmem:[#allocation5 + $0x5e8] ss:$16 sps:$4 sm:$0xff]  }
  0xd9   :  { %1819 = vmatpush1.bf16.msra.mxu1 %v3417_v23  ;;  %v3566_v23 = vld [vmem:[#allocation5 + $0x56c] ss:$16 sps:$4 sm:$0xff]  }
  0xda   :  { %1820 = vmatprep.subr.bf16.mxu1 %v3425_v24  ;;  %1938 = vmatpush1.bf16.msra.mxu0 %v3504_v44  ;;  %v3501_v24 = vld [vmem:[#allocation5 + $0x228] ss:$16 sps:$4 sm:$0xff]  }
  0xdb   :  { %1939 = vmatprep.subr.bf16.mxu0 %v3512_v45  ;;  %v3639_v44 = vld [vmem:[#allocation7] ss:$8 sps:$4 sm:$0xff]   ;;  %v3641_v45 = vld [vmem:[#allocation7 + $0x4] ss:$8 sps:$4 sm:$0xff]  }
  0xdd   :  { %1821 = vmatpush1.bf16.msra.mxu1 %v3423_v28  ;;  %v3572_v28 = vld [vmem:[#allocation5 + $0x58c] ss:$16 sps:$4 sm:$0xff]  }
  0xde   :  { %1822 = vmatprep.subr.bf16.mxu1 %v3431_v29  ;;  %1940 = vmatpush1.bf16.msra.mxu0 %v3510_v47  ;;  %v3507_v29 = vld [vmem:[#allocation5 + $0x248] ss:$16 sps:$4 sm:$0xff]  }
  0xdf   :  { %1941 = vmatprep.subr.bf16.mxu0 %v3518_v58  ;;  %v3537_v47 = vld [vmem:[#allocation5 + $0x2e8] ss:$16 sps:$4 sm:$0xff]  }
  0xe0   :  { %v3642_v58 = vld [vmem:[#allocation7 + $0x10] ss:$8 sps:$4 sm:$0xff]  }
  0xe1   :  { %1823 = vmatpush1.bf16.msra.mxu1 %v3429_v32  ;;  %v3578_v32 = vld [vmem:[#allocation5 + $0x5ac] ss:$16 sps:$4 sm:$0xff]  }
  0xe2   :  { %1824 = vmatprep.subr.bf16.mxu1 %v3437_v33  ;;  %1942 = vmatpush1.bf16.msra.mxu0 %v3516_v50  ;;  %v3513_v33 = vld [vmem:[#allocation5 + $0x268] ss:$16 sps:$4 sm:$0xff]  }
  0xe3   :  { %1943 = vmatprep.subr.bf16.mxu0 %v3524_v52  ;;  %v3543_v50 = vld [vmem:[#allocation5 + $0x308] ss:$16 sps:$4 sm:$0xff]  }
  0xe4   :  { %v3645_v52 = vld [vmem:[#allocation7 + $0x20] ss:$8 sps:$4 sm:$0xff]  }
  0xe5   :  { %1825 = vmatpush1.bf16.msra.mxu1 %v3435_v38  ;;  %v3582_v38 = vld [vmem:[#allocation5 + $0x5c8] ss:$16 sps:$4 sm:$0xff]  }
  0xe6   :  { %1826 = vmatprep.subr.bf16.mxu1 %v3443_v39  ;;  %1944 = vmatpush1.bf16.msra.mxu0 %v3522_v18  ;;  %v3590_v39 = vld [vmem:[#allocation5 + $0x5ec] ss:$16 sps:$4 sm:$0xff]   ;;  %v3648_v18 = vld [vmem:[#allocation7 + $0x30] ss:$8 sps:$4 sm:$0xff]  }
  0xe7   :  { %1945 = vmatprep.subr.bf16.mxu0 %v3530_v54  ;;  %v3653_v54 = vld [vmem:[#allocation7 + $0x44] ss:$8 sps:$4 sm:$0xff]  }
  0xe9   :  { %1827 = vmatpush1.bf16.msra.mxu1 %v3441_v42  ;;  %v3533_v42 = vld [vmem:[#allocation5 + $0x2cc] ss:$16 sps:$4 sm:$0xff]  }
  0xea   :  { %1828 = vmatprep.subr.bf16.mxu1 %v3449_v43  ;;  %1946 = vmatpush1.bf16.msra.mxu0 %v3528_v57  ;;  %v3531_v43 = vld [vmem:[#allocation5 + $0x2c8] ss:$16 sps:$4 sm:$0xff]  }
  0xeb   :  { %1947 = vmatprep.subr.bf16.mxu0 %v3536_v59  ;;  %v3651_v57 = vld [vmem:[#allocation7 + $0x40] ss:$8 sps:$4 sm:$0xff]   ;;  %v3656_v59 = vld [vmem:[#allocation7 + $0x54] ss:$8 sps:$4 sm:$0xff]  }
  0xed   :  { %1829 = vmatpush1.bf16.msra.mxu1 %v3447_v46  ;;  %v3644_v46 = vld [vmem:[#allocation7 + $0x14] ss:$8 sps:$4 sm:$0xff]  }
  0xee   :  { %1830 = vmatprep.subr.bf16.mxu1 %v3455_v48  ;;  %1948 = vmatpush1.bf16.msra.mxu0 %v3534_v62  ;;  %v3545_v48 = vld [vmem:[#allocation5 + $0x30c] ss:$16 sps:$4 sm:$0xff]   ;;  %v3654_v62 = vld [vmem:[#allocation7 + $0x50] ss:$8 sps:$4 sm:$0xff]  }
  0xef   :  { %1949 = vmatprep.subr.bf16.mxu0 %v3542_v63  ;;  %v3659_v63 = vld [vmem:[#allocation7 + $0x64] ss:$8 sps:$4 sm:$0xff]  }
  0xf1   :  { %1831 = vmatpush1.bf16.msra.mxu1 %v3453_v49  ;;  %v3647_v49 = vld [vmem:[#allocation7 + $0x24] ss:$8 sps:$4 sm:$0xff]  }
  0xf2   :  { %1832 = vmatprep.subr.bf16.mxu1 %v3461_v51  ;;  %1950 = vmatpush1.bf16.msra.mxu0 %v3540_v3  ;;  %v3551_v51 = vld [vmem:[#allocation5 + $0x32c] ss:$16 sps:$4 sm:$0xff]   ;;  %v3657_v3 = vld [vmem:[#allocation7 + $0x60] ss:$8 sps:$4 sm:$0xff]  }
  0xf3   :  { %1951 = vmatprep.subr.bf16.mxu0 %v3548_v5  ;;  %v3662_v5 = vld [vmem:[#allocation7 + $0x74] ss:$8 sps:$4 sm:$0xff]  }
  0xf5   :  { %1833 = vmatpush1.bf16.msra.mxu1 %v3459_v4  ;;  %v3650_v4 = vld [vmem:[#allocation7 + $0x34] ss:$8 sps:$4 sm:$0xff]  }
  0xf6   :  { %1834 = vmatprep.subr.bf16.mxu1 %v3467_v53  ;;  %1952 = vmatpush1.bf16.msra.mxu0 %v3546_v9  ;;  %v3557_v53 = vld [vmem:[#allocation5 + $0x34c] ss:$16 sps:$4 sm:$0xff]   ;;  %v3660_v9 = vld [vmem:[#allocation7 + $0x70] ss:$8 sps:$4 sm:$0xff]  }
  0xf7   :  { %1953 = vmatprep.subr.bf16.mxu0 %v3554_v10  ;;  %v3665_v10 = vld [vmem:[#allocation7 + $0x84] ss:$8 sps:$4 sm:$0xff]  }
  0xf9   :  { %1835 = vmatpush1.bf16.msra.mxu1 %v3465_v55  ;;  %v3555_v55 = vld [vmem:[#allocation5 + $0x348] ss:$16 sps:$4 sm:$0xff]  }
  0xfa   :  { %1836 = vmatprep.subr.bf16.mxu1 %v3473_v56  ;;  %1954 = vmatpush1.bf16.msra.mxu0 %v3552_v15  ;;  %v3563_v56 = vld [vmem:[#allocation5 + $0x36c] ss:$16 sps:$4 sm:$0xff]  }
  0xfb   :  { %1955 = vmatprep.subr.bf16.mxu0 %v3560_v17  ;;  %v3668_v15 = vld [vmem:[#allocation7 + $0x94] ss:$8 sps:$4 sm:$0xff]   ;;  %v3585_v17 = vld [vmem:[#allocation5 + $0x3e8] ss:$16 sps:$4 sm:$0xff]  }
  0xfd   :  { %1837 = vmatpush1.bf16.msra.mxu1 %v3471_v60  ;;  %v3561_v60 = vld [vmem:[#allocation5 + $0x368] ss:$16 sps:$4 sm:$0xff]  }
  0xfe   :  { %1838 = vmatprep.subr.bf16.mxu1 %v3479_v61  ;;  %1956 = vmatpush1.bf16.msra.mxu0 %v3558_v20  ;;  %v3569_v61 = vld [vmem:[#allocation5 + $0x38c] ss:$16 sps:$4 sm:$0xff]   ;;  %v3666_v20 = vld [vmem:[#allocation7 + $0x90] ss:$8 sps:$4 sm:$0xff]  }
  0xff   :  { %1957 = vmatprep.subr.bf16.mxu0 %v3566_v23  ;;  %v3591_v23 = vld [vmem:[#allocation5 + $0x608] ss:$16 sps:$4 sm:$0xff]  }
 0x101   :  { %1839 = vmatpush1.bf16.msra.mxu1 %v3477_v1  ;;  %v3567_v1 = vld [vmem:[#allocation5 + $0x388] ss:$16 sps:$4 sm:$0xff]  }
 0x102   :  { %1840 = vmatprep.subr.bf16.mxu1 %v3485_v2  ;;  %1958 = vmatpush1.bf16.msra.mxu0 %v3564_v25  ;;  %v3575_v2 = vld [vmem:[#allocation5 + $0x3ac] ss:$16 sps:$4 sm:$0xff]   ;;  %v3669_v25 = vld [vmem:[#allocation7 + $0xa0] ss:$8 sps:$4 sm:$0xff]  }
 0x103   :  { %1959 = vmatprep.subr.bf16.mxu0 %v3572_v28  ;;  %v3594_v28 = vld [vmem:[#allocation5 + $0x628] ss:$16 sps:$4 sm:$0xff]  }
 0x105   :  { %1841 = vmatpush1.bf16.msra.mxu1 %v3483_v6  ;;  %v3573_v6 = vld [vmem:[#allocation5 + $0x3a8] ss:$16 sps:$4 sm:$0xff]  }
 0x106   :  { %1842 = vmatprep.subr.bf16.mxu1 %v3491_v8  ;;  %1960 = vmatpush1.bf16.msra.mxu0 %v3570_v30  ;;  %v3581_v8 = vld [vmem:[#allocation5 + $0x3cc] ss:$16 sps:$4 sm:$0xff]   ;;  %v3672_v30 = vld [vmem:[#allocation7 + $0xb0] ss:$8 sps:$4 sm:$0xff]  }
 0x107   :  { %1961 = vmatprep.subr.bf16.mxu0 %v3578_v32  ;;  %v369_v32 = vlaneseq }
 0x109   :  { %1843 = vmatpush1.bf16.msra.mxu1 %v3489_v11  ;;  %v3579_v11 = vld [vmem:[#allocation5 + $0x3c8] ss:$16 sps:$4 sm:$0xff]  }
 0x10a   :  { %1894 = vmatprep.subr.bf16.mxu1 %v3497_v14  ;;  %1962 = vmatpush1.bf16.msra.mxu0 %v3576_v34  ;;  %v3663_v14 = vld [vmem:[#allocation7 + $0x80] ss:$8 sps:$4 sm:$0xff]  }
 0x10b   :  { %1963 = vmatprep.subr.bf16.mxu0 %v3584_v36  ;;  %v3600_v34 = vld [vmem:[#allocation5 + $0x668] ss:$16 sps:$4 sm:$0xff]  }
 0x10c   :  { %1845 = vmatmul.mubr.bf16.vlgmr.msra.gmra.mrb[8].mxu1 %v4015_v21 }
 0x10d   :  { %1895 = vmatpush1.bf16.msra.mxu1 %v3495_v19  ;;  %1926 = vmatprep.mubr.bf16.mxu1 %v3987_v0  ;;  %v3527_v0 = vld [vmem:[#allocation5 + $0x2ac] ss:$16 sps:$4 sm:$0xff]  }
 0x10e   :  { %1896 = vmatprep.subr.bf16.mxu1 %v3503_v22  ;;  %1964 = vmatpush1.bf16.msra.mxu0 %v3582_v38  ;;  %v3593_v19 = vld [vmem:[#allocation5 + $0x60c] ss:$16 sps:$4 sm:$0xff]   ;;  %v3603_v38 = vld [vmem:[#allocation5 + $0x688] ss:$16 sps:$4 sm:$0xff]  }
 0x10f   :  { %1965 = vmatprep.subr.bf16.mxu0 %v3590_v39  ;;  %v3671_v22 = vld [vmem:[#allocation7 + $0xa4] ss:$8 sps:$4 sm:$0xff]  }
 0x110   :  { %v3608_v39 = vld [vmem:[#allocation5 + $0x6ac] ss:$16 sps:$4 sm:$0xff]  }
 0x111   :  { %1897 = vmatpush1.bf16.msra.mxu1 %v3501_v24  ;;  %v3596_v24 = vld [vmem:[#allocation5 + $0x62c] ss:$16 sps:$4 sm:$0xff]  }
 0x112   :  { %1898 = vmatprep.subr.bf16.mxu1 %v3509_v27  ;;  %1966 = vmatpush1.bf16.msra.mxu0 %v3588_v41  ;;  %v3674_v27 = vld [vmem:[#allocation7 + $0xb4] ss:$8 sps:$4 sm:$0xff]  }
 0x113   :  { %2591 = vmatprep.subr.bf16.mxu0 %v3641_v45  ;;  %v3611_v45 = vld [vmem:[#allocation5 + $0x6cc] ss:$16 sps:$4 sm:$0xff]  }
 0x115   :  { %1899 = vmatpush1.bf16.msra.mxu1 %v3507_v29  ;;  %1968 = vmatmul.mubr.bf16.vlgmr.msra.gmra.mrb[8].mxu0 %v4000_v26  ;;  %v3549_v26 = vld [vmem:[#allocation5 + $0x328] ss:$16 sps:$4 sm:$0xff]   ;;  %v3599_v29 = vld [vmem:[#allocation5 + $0x64c] ss:$16 sps:$4 sm:$0xff]  }
 0x116   :  { %1900 = vmatprep.subr.bf16.mxu1 %v3515_v31  ;;  %2592 = vmatpush1.bf16.msra.mxu0 %v3639_v44  ;;  %v3597_v31 = vld [vmem:[#allocation5 + $0x648] ss:$16 sps:$4 sm:$0xff]  }
 0x117   :  { %2593 = vmatprep.subr.bf16.mxu0 %v3644_v46 }
 0x119   :  { %1901 = vmatpush1.bf16.msra.mxu1 %v3513_v33  ;;  %v3602_v33 = vld [vmem:[#allocation5 + $0x66c] ss:$16 sps:$4 sm:$0xff]  }
 0x11a   :  { %1902 = vmatprep.subr.bf16.mxu1 %v3521_v35  ;;  %2594 = vmatpush1.bf16.msra.mxu0 %v3642_v58  ;;  %v4022_v35 = vshrl.u32 %v369_v32, 7  ;;  %v3675_v58 = vld [vmem:[#allocation7 + $0xc0] ss:$8 sps:$4 sm:$0xff]  }
 0x11b   :  { %2595 = vmatprep.subr.bf16.mxu0 %v3647_v49  ;;  %v3636_v32 = vld [vmem:[#allocation5 + $0x7e8] ss:$16 sps:$4 sm:$0xff]  }
 0x11c   :  { %v2075_v36 = vsub.s32 6, %v4022_v35  ;;  %v4038_v41 = vsub.s32 2, %v4022_v35 }
 0x11d   :  { %1903 = vmatpush1.bf16.msra.mxu1 %v3519_v37  ;;  %v2027_v37 = vsub.s32 5, %v4022_v35 }
 0x11e   :  { %1904 = vmatprep.subr.bf16.mxu1 %v3527_v0  ;;  %2596 = vmatpush1.bf16.msra.mxu0 %v3645_v52  ;;  %v3609_v52 = vld [vmem:[#allocation5 + $0x6c8] ss:$16 sps:$4 sm:$0xff]  }
 0x11f   :  { %2597 = vmatprep.subr.bf16.mxu0 %v3650_v4 }
 0x121   :  { %1905 = vmatpush1.bf16.msra.mxu1 %v3525_v40 }
 0x122   :  { %1906 = vmatprep.subr.bf16.mxu1 %v3533_v42  ;;  %2598 = vmatpush1.bf16.msra.mxu0 %v3648_v18  ;;  %v4041_v42 = vsub.s32 1, %v4022_v35  ;;  %v3614_v18 = vld [vmem:[#allocation5 + $0x6ec] ss:$16 sps:$4 sm:$0xff]  }
 0x123   :  { %2599 = vmatprep.subr.bf16.mxu0 %v3653_v54 }
 0x125   :  { %1907 = vmatpush1.bf16.msra.mxu1 %v3531_v43  ;;  %v4043_v43 = vpop.permute.xlu0 %364 }
 0x126   :  { %1908 = vmatprep.subr.bf16.mxu1 %v3539_v16  ;;  %2600 = vmatpush1.bf16.msra.mxu0 %v3651_v57  ;;  %v3606_v16 = vld [vmem:[#allocation5 + $0x6a8] ss:$16 sps:$4 sm:$0xff]  }
 0x127   :  { %2601 = vmatprep.subr.bf16.mxu0 %v3656_v59  ;;  %v3678_v57 = vld [vmem:[#allocation7 + $0xd0] ss:$8 sps:$4 sm:$0xff]  }
 0x128   :  { %v3612_v59 = vld [vmem:[#allocation5 + $0x6e8] ss:$16 sps:$4 sm:$0xff]  }
 0x129   :  { %1909 = vmatpush1.bf16.msra.mxu1 %v3537_v47  ;;  %v3677_v47 = vld [vmem:[#allocation7 + $0xc4] ss:$8 sps:$4 sm:$0xff]  }
 0x12a   :  { %1910 = vmatprep.subr.bf16.mxu1 %v3545_v48  ;;  %2602 = vmatpush1.bf16.msra.mxu0 %v3654_v62  ;;  %v3617_v62 = vld [vmem:[#allocation5 + $0x70c] ss:$16 sps:$4 sm:$0xff]  }
 0x12b   :  { %2603 = vmatprep.subr.bf16.mxu0 %v3659_v63  ;;  %v3683_v63 = vld [vmem:[#allocation7 + $0xe4] ss:$8 sps:$4 sm:$0xff]  }
 0x12d   :  { %1911 = vmatpush1.bf16.msra.mxu1 %v3543_v50  ;;  %v4051_v50 = vpop.permute.xlu1 %2066 }
 0x12e   :  { %1912 = vmatprep.subr.bf16.mxu1 %v3551_v51  ;;  %2604 = vmatpush1.bf16.msra.mxu0 %v3657_v3 }
 0x12f   :  { %2605 = vmatprep.subr.bf16.mxu0 %v3662_v5  ;;  %v3686_v5 = vld [vmem:[#allocation7 + $0xf4] ss:$8 sps:$4 sm:$0xff]  }
 0x131   :  { %1913 = vmatpush1.bf16.msra.mxu1 %v3549_v26  ;;  %v4056_v26 = vpop.permute.xlu0 %2018  ;;  %v4069_v3 = vpop.permute.xlu1 %2114 }
 0x132   :  { %1914 = vmatprep.subr.bf16.mxu1 %v3557_v53  ;;  %2606 = vmatpush1.bf16.msra.mxu0 %v3660_v9  ;;  %v3620_v9 = vld [vmem:[#allocation5 + $0x72c] ss:$16 sps:$4 sm:$0xff]  }
 0x133   :  { %2607 = vmatprep.subr.bf16.mxu0 %v3665_v10  ;;  %v3684_v10 = vld [vmem:[#allocation7 + $0xf0] ss:$8 sps:$4 sm:$0xff]  }
 0x135   :  { %1915 = vmatpush1.bf16.msra.mxu1 %v3555_v55  ;;  %v3680_v55 = vld [vmem:[#allocation7 + $0xd4] ss:$8 sps:$4 sm:$0xff]  }
 0x136   :  { %1916 = vmatprep.subr.bf16.mxu1 %v3563_v56  ;;  %2608 = vmatpush1.bf16.msra.mxu0 %v3663_v14  ;;  %v2123_v56 = vsub.s32 7, %v4022_v35  ;;  %v3621_v14 = vld [vmem:[#allocation5 + $0x748] ss:$16 sps:$4 sm:$0xff]  }
 0x137   :  { %2609 = vmatprep.subr.bf16.mxu0 %v3668_v15  ;;  %v3626_v15 = vld [vmem:[#allocation5 + $0x76c] ss:$16 sps:$4 sm:$0xff]  }
 0x139   :  { %1917 = vmatpush1.bf16.msra.mxu1 %v3561_v60  ;;  %v4063_v60 = vsub.s32 3, %v4022_v35 }
 0x13a   :  { %1918 = vmatprep.subr.bf16.mxu1 %v3569_v61  ;;  %2610 = vmatpush1.bf16.msra.mxu0 %v3666_v20 }
 0x13b   :  { %2611 = vmatprep.subr.bf16.mxu0 %v3671_v22 }
 0x13d   :  { %1919 = vmatpush1.bf16.msra.mxu1 %v3567_v1 }
 0x13e   :  { %1920 = vmatprep.subr.bf16.mxu1 %v3575_v2  ;;  %2612 = vmatpush1.bf16.msra.mxu0 %v3669_v25  ;;  %v3681_v2 = vld [vmem:[#allocation7 + $0xe0] ss:$8 sps:$4 sm:$0xff]   ;;  %v3632_v25 = vld [vmem:[#allocation5 + $0x7ac] ss:$16 sps:$4 sm:$0xff]  }
 0x13f   :  { %2613 = vmatprep.subr.bf16.mxu0 %v3674_v27 }
 0x141   :  { %1921 = vmatpush1.bf16.msra.mxu1 %v3573_v6  ;;  %v3615_v6 = vld [vmem:[#allocation5 + $0x708] ss:$16 sps:$4 sm:$0xff]  }
 0x142   :  { %1922 = vmatprep.subr.bf16.mxu1 %v3581_v8  ;;  %2614 = vmatpush1.bf16.msra.mxu0 %v3672_v30  ;;  %v3633_v30 = vld [vmem:[#allocation5 + $0x7c8] ss:$16 sps:$4 sm:$0xff]  }
 0x143   :  { %2615 = vmatprep.subr.bf16.mxu0 %v3677_v47 }
 0x145   :  { %1923 = vmatpush1.bf16.msra.mxu1 %v3579_v11  ;;  %v3618_v11 = vld [vmem:[#allocation5 + $0x728] ss:$16 sps:$4 sm:$0xff]  }
 0x146   :  { %1924 = vmatprep.subr.bf16.mxu1 %v3587_v13  ;;  %2616 = vmatpush1.bf16.msra.mxu0 %v3675_v58  ;;  %v3623_v13 = vld [vmem:[#allocation5 + $0x74c] ss:$16 sps:$4 sm:$0xff]  }
 0x147   :  { %2617 = vmatprep.subr.bf16.mxu0 %v3680_v55 }
 0x149   :  { %1925 = vmatpush1.bf16.msra.mxu1 %v3585_v17  ;;  %v3624_v17 = vld [vmem:[#allocation5 + $0x768] ss:$16 sps:$4 sm:$0xff]  }
 0x14a   :  { %1976 = vmatprep.subr.bf16.mxu1 %v3593_v19  ;;  %2618 = vmatpush1.bf16.msra.mxu0 %v3678_v57  ;;  %v3629_v19 = vld [vmem:[#allocation5 + $0x78c] ss:$16 sps:$4 sm:$0xff]  }
 0x14b   :  { %2619 = vmatprep.subr.bf16.mxu0 %v3683_v63  ;;  %v3689_v57 = vld [vmem:[#allocation7 + $0x104] ss:$8 sps:$4 sm:$0xff]  }
 0x14c   :  { %1927 = vmatmul.mubr.bf16.vlgmr.msra.gmra.mrb[12].mxu1 %v4004_v7  ;;  %v3605_v7 = vld [vmem:[#allocation5 + $0x68c] ss:$16 sps:$4 sm:$0xff]  }
 0x14d   :  { %1977 = vmatpush1.bf16.msra.mxu1 %v3591_v23  ;;  %2008 = vmatprep.mubr.bf16.mxu1 %v4006_v12  ;;  %v4028_v12 = vld [vmem:[%s4184_s3 + $0x8] sm:$0xff] }
 0x14e   :  { %1978 = vmatprep.subr.bf16.mxu1 %v3596_v24  ;;  %v2084_v0 = vrot.slane %v4028_v12, %v2075_v36  ;;  %v2036_v40 = vrot.slane %v4028_v12, %v2027_v37  ;;  %v2132_v61 = vrot.slane %v4028_v12, %v2123_v56  ;;  %2620 = vmatpush1.bf16.msra.mxu0 %v3681_v2  ;;  %v3627_v23 = vld [vmem:[#allocation5 + $0x788] ss:$16 sps:$4 sm:$0xff]  }
 0x14f   :  { %2621 = vmatprep.subr.bf16.mxu0 %v3686_v5 }
 0x150   :  { %v2104_v44 = vrot.slane %v2084_v0, %v4038_v41  ;;  %v2056_v46 = vrot.slane %v2036_v40, %v4041_v42  ;;  %v2152_v1 = vrot.slane %v2132_v61, %v4063_v60 }
 0x151   :  { %1979 = vmatpush1.bf16.msra.mxu1 %v3594_v28  ;;  %v3630_v28 = vld [vmem:[#allocation5 + $0x7a8] ss:$16 sps:$4 sm:$0xff]  }
 0x152   :  { %1980 = vmatprep.subr.bf16.mxu1 %v3599_v29  ;;  %v4054_v4 = vmul.f32 %v2104_v44, %v4051_v50  ;;  %v4059_v54 = vmul.f32 %v2056_v46, %v4056_v26  ;;  %v4072_v8 = vmul.f32 %v2152_v1, %v4069_v3  ;;  %2622 = vmatpush1.bf16.msra.mxu0 %v3684_v10  ;;  %v3635_v29 = vld [vmem:[#allocation5 + $0x7cc] ss:$16 sps:$4 sm:$0xff]  }
 0x153   :  { %2632 = vmatprep.subr.bf16.mxu0 %v3689_v57  ;;  %v3695_v57 = vld [vmem:[#allocation7 + $0x124] ss:$8 sps:$4 sm:$0xff]  }
 0x155   :  { %1981 = vmatpush1.bf16.msra.mxu1 %v3597_v31  ;;  %v3638_v31 = vld [vmem:[#allocation5 + $0x7ec] ss:$16 sps:$4 sm:$0xff]  }
 0x156   :  { %1982 = vmatprep.subr.bf16.mxu1 %v3602_v33  ;;  %v4076_v33 = vsub.s32 0, %v4022_v35 }
 0x159   :  { %1983 = vmatpush1.bf16.msra.mxu1 %v3600_v34  ;;  %v360_v34 = vld [vmem:[%s4184_s3] sm:$0xff] }
 0x15a   :  { %1984 = vmatprep.subr.bf16.mxu1 %v3605_v7  ;;  %v375_v7 = vsub.s32 4, %v4022_v35  ;;  %v2072_v1 = vrot.slane %v360_v34, %v4038_v41  ;;  %v2076_v2 = vrot.slane %v360_v34, %v2075_v36  ;;  %v2124_v10 = vrot.slane %v360_v34, %v2123_v56  ;;  %v3723_v35 = vld [vmem:[#allocation7 + $0x1c0] ss:$8 sps:$4 sm:$0xff]  }
 0x15c   :  { %v376_v0 = vrot.slane %v360_v34, %v375_v7 }
 0x15d   :  { %1985 = vmatpush1.bf16.msra.mxu1 %v3603_v38  ;;  %v372_v38 = vrot.slane %v360_v34, %v4076_v33 }
 0x15e   :  { %1986 = vmatprep.subr.bf16.mxu1 %v3608_v39  ;;  %v396_v40 = vrot.slane %v376_v0, %v4076_v33 }
 0x15f   :  { %v4047_v48 = vpop.f32.mrb[0].mxu1  ;;  %v392_v39 = vrot.slane %v372_v38, %v4076_v33 }
 0x160   :  { %v4049_v49 = vpop.f32.mrb[1].mxu1 }
 0x161   :  { %v1727_v51 = vpop.f32.mrb[2].mxu1  ;;  %1987 = vmatpush1.bf16.msra.mxu1 %v3606_v16  ;;  %v406_v16 = vmul.f32 %v396_v40, %v4043_v43 }
 0x162   :  { %v1728_v53 = vpop.f32.mrb[3].mxu1  ;;  %1988 = vmatprep.subr.bf16.mxu1 %v3611_v45 }
 0x163   :  { %v1726_v45 = vadd.f32 %v4049_v49, %v406_v16  ;;  %v2028_v49 = vrot.slane %v360_v34, %v2027_v37 }
 0x165   :  { %1989 = vmatpush1.bf16.msra.mxu1 %v3609_v52 }
 0x166   :  { %1990 = vmatprep.subr.bf16.mxu1 %v3614_v18 }
 0x168   :  { %v1805_v20 = vpop.f32.mrb[0].mxu0 }
 0x169   :  { %1991 = vmatpush1.bf16.msra.mxu1 %v3612_v59  ;;  %v1807_v22 = vpop.f32.mrb[1].mxu0 }
 0x16a   :  { %1992 = vmatprep.subr.bf16.mxu1 %v3617_v62  ;;  %v1809_v24 = vpop.f32.mrb[2].mxu0 }
 0x16b   :  { %v1810_v27 = vpop.f32.mrb[3].mxu0 }
 0x16d   :  { %1993 = vmatpush1.bf16.msra.mxu1 %v3615_v6  ;;  %v2120_v6 = vrot.slane %v360_v34, %v4063_v60 }
 0x16e   :  { %1994 = vmatprep.subr.bf16.mxu1 %v3620_v9  ;;  %v2048_v9 = vrot.slane %v2028_v49, %v4041_v42  ;;  %v3698_v49 = vld [vmem:[#allocation7 + $0x134] ss:$8 sps:$4 sm:$0xff]  }
 0x171   :  { %1995 = vmatpush1.bf16.msra.mxu1 %v3618_v11  ;;  %v2092_v11 = vrot.slane %v2072_v1, %v4038_v41 }
 0x172   :  { %1996 = vmatprep.subr.bf16.mxu1 %v3623_v13  ;;  %v2096_v13 = vrot.slane %v2076_v2, %v4038_v41  ;;  %v3740_v2 = vld [vmem:[#allocation8 + $0x10] sm:$0xff]  }
 0x175   :  { %1997 = vmatpush1.bf16.msra.mxu1 %v3621_v14  ;;  %v2140_v14 = vrot.slane %v2120_v6, %v4063_v60  ;;  %v3741_v6 = vld [vmem:[#allocation8 + $0x58] sm:$0xff]  }
 0x176   :  { %1998 = vmatprep.subr.bf16.mxu1 %v3626_v15  ;;  %v2058_v15 = vmul.f32 %v2048_v9, %v4056_v26  ;;  %v3696_v9 = vld [vmem:[#allocation7 + $0x130] ss:$8 sps:$4 sm:$0xff]  }
 0x179   :  { %1999 = vmatpush1.bf16.msra.mxu1 %v3624_v17  ;;  %v2144_v17 = vrot.slane %v2124_v10, %v4063_v60 }
 0x17a   :  { %2000 = vmatprep.subr.bf16.mxu1 %v3629_v19  ;;  %v2105_v19 = vmul.f32 %v2092_v11, %v4051_v50  ;;  %v3701_v11 = vld [vmem:[#allocation7 + $0x144] ss:$8 sps:$4 sm:$0xff]  }
 0x17d   :  { %2001 = vmatpush1.bf16.msra.mxu1 %v3627_v23  ;;  %v2106_v23 = vmul.f32 %v2096_v13, %v4051_v50 }
 0x17e   :  { %2002 = vmatprep.subr.bf16.mxu1 %v3632_v25  ;;  %v4117_v25 = vld [vmem:[%s4185_s4] sm:$0xf] }
 0x17f   :  { %v2170_v0 = vrot.slane %v4117_v25, %v4041_v42 }
 0x181   :  { %2003 = vmatpush1.bf16.msra.mxu1 %v3630_v28 }
 0x182   :  { %2004 = vmatprep.subr.bf16.mxu1 %v3635_v29  ;;  %v2153_v29 = vmul.f32 %v2140_v14, %v4069_v3  ;;  %v3743_v14 = vld [vmem:[#allocation8 + $0x60] sm:$0xff]  }
 0x185   :  { %2005 = vmatpush1.bf16.msra.mxu1 %v3633_v30 }
 0x186   :  { %2006 = vmatprep.subr.bf16.mxu1 %v3638_v31  ;;  %v2154_v31 = vmul.f32 %v2144_v17, %v4069_v3  ;;  %v3744_v17 = vld [vmem:[#allocation8 + $0x20] sm:$0xff]  }
 0x189   :  { %2007 = vmatpush1.bf16.msra.mxu1 %v3636_v32 }
 0x18c   :  { %2009 = vmatmul.mubr.bf16.vlgmr.msra.gmra.mrb[16].mxu1 %v4015_v21  ;;  %v405_v21 = vmul.f32 %v392_v39, %v4043_v43 }
 0x18e   :  { %v1724_v44 = vadd.f32 %v4047_v48, %v405_v21  ;;  %v2024_v48 = vrot.slane %v360_v34, %v4041_v42  ;;  %v2166_v34 = vrot.slane %v4117_v25, %v4076_v33 }
 0x190   :  { %v2044_v5 = vrot.slane %v2024_v48, %v4041_v42  ;;  %v3693_v48 = vld [vmem:[#allocation7 + $0x120] ss:$8 sps:$4 sm:$0xff]  }
 0x192   :  { %v2057_v37 = vmul.f32 %v2044_v5, %v4056_v26 }
 0x19f   :  { %v1764_v46 = vpop.f32.mrb[4].mxu1 }
 0x1a0   :  { %v1765_v47 = vadd.f32 %v1764_v46, %v1724_v44  ;;  %v1766_v58 = vpop.f32.mrb[5].mxu1 }
 0x1a1   :  { %v1767_v51 = vadd.f32 %v1766_v58, %v1726_v45  ;;  %v1768_v52 = vpop.f32.mrb[6].mxu1 }
 0x1a2   :  { %v1806_v53 = vadd.f32 %v1805_v20, %v1765_v47  ;;  %v1769_v18 = vpop.f32.mrb[7].mxu1  ;;  %v3687_v47 = vld [vmem:[#allocation7 + $0x100] ss:$8 sps:$4 sm:$0xff]  }
 0x1a3   :  { %v1808_v55 = vadd.f32 %v1807_v22, %v1767_v51  ;;  %v3692_v51 = vld [vmem:[#allocation7 + $0x114] ss:$8 sps:$4 sm:$0xff]   ;;  %v3735_v52 = vld [vmem:[#allocation8 + $0x40] sm:$0xff]   ;;  %v3737_v18 = vld [vmem:[#allocation8 + $0x48] sm:$0xff]  }
 0x1a4   :  { %3207 = vmatprep.subr.bf16.mxu1 %v3735_v52 }
 0x1a8   :  { %v4091_v59 = vpop.f32.mrb[4].mxu0 }
 0x1a9   :  { %v4093_v61 = vpop.f32.mrb[5].mxu0 }
 0x1aa   :  { %v1891_v62 = vpop.f32.mrb[6].mxu0 }
 0x1ab   :  { %v1892_v63 = vpop.f32.mrb[7].mxu0  ;;  %v3738_v62 = vld [vmem:[#allocation8 + $0x8] sm:$0xff]  }
 0x1ac   :  { %v3739_v63 = vld [vmem:[#allocation8 + $0x50] sm:$0xff]  }
 0x1df   :  { %v1846_v36 = vpop.f32.mrb[8].mxu1 }
 0x1e0   :  { %v1847_v20 = vadd.f32 %v1846_v36, %v1806_v53  ;;  %v1848_v22 = vpop.f32.mrb[9].mxu1  ;;  %v3736_v53 = vld [vmem:[#allocation8] sm:$0xff]   ;;  %v3704_v36 = vld [vmem:[#allocation7 + $0x154] ss:$8 sps:$4 sm:$0xff]  }
 0x1e1   :  { %v1849_v56 = vadd.f32 %v1848_v22, %v1808_v55  ;;  %v1850_v24 = vpop.f32.mrb[10].mxu1  ;;  %v3690_v55 = vld [vmem:[#allocation7 + $0x110] ss:$8 sps:$4 sm:$0xff]   ;;  %3208 = vmatpush3.bf16.msra.mxu1 %v3736_v53  ;;  %v3707_v22 = vld [vmem:[#allocation7 + $0x164] ss:$8 sps:$4 sm:$0xff]  }
 0x1e2   :  { %v2061_v27 = vadd.f32 %v2057_v37, %v1847_v20  ;;  %v1851_v28 = vpop.f32.mrb[11].mxu1  ;;  %3209 = vmatprep.subr.bf16.mxu1 %v3737_v18  ;;  %v3742_v37 = vld [vmem:[#allocation8 + $0x18] sm:$0xff]  }
 0x1e3   :  { %v2062_v30 = vadd.f32 %v2058_v15, %v1849_v56  ;;  %v3699_v15 = vld [vmem:[#allocation7 + $0x140] ss:$8 sps:$4 sm:$0xff]   ;;  %v3702_v20 = vld [vmem:[#allocation7 + $0x150] ss:$8 sps:$4 sm:$0xff]   ;;  %v3710_v24 = vld [vmem:[#allocation7 + $0x174] ss:$8 sps:$4 sm:$0xff]  }
 0x1e4   :  { %v2109_v32 = vadd.f32 %v2105_v19, %v2061_v27  ;;  %v3745_v19 = vld [vmem:[#allocation8 + $0x68] sm:$0xff]   ;;  %v3708_v27 = vld [vmem:[#allocation7 + $0x170] ss:$8 sps:$4 sm:$0xff]  }
 0x1e5   :  { %v2110_v38 = vadd.f32 %v2106_v23, %v2062_v30  ;;  %3210 = vmatpush3.bf16.msra.mxu1 %v3738_v62  ;;  %v3746_v23 = vld [vmem:[#allocation8 + $0x28] sm:$0xff]   ;;  %v3716_v30 = vld [vmem:[#allocation7 + $0x194] ss:$8 sps:$4 sm:$0xff]  }
 0x1e6   :  { %v2157_v39 = vadd.f32 %v2153_v29, %v2109_v32  ;;  %3211 = vmatprep.subr.bf16.mxu1 %v3739_v63  ;;  %v3705_v56 = vld [vmem:[#allocation7 + $0x160] ss:$8 sps:$4 sm:$0xff]   ;;  %v3713_v28 = vld [vmem:[#allocation7 + $0x184] ss:$8 sps:$4 sm:$0xff]   ;;  %v380_v32 = vrot.slane %v4028_v12, %v4076_v33 }
 0x1e7   :  { %v2158_v40 = vadd.f32 %v2154_v31, %v2110_v38  ;;  %v3711_v29 = vld [vmem:[#allocation7 + $0x180] ss:$8 sps:$4 sm:$0xff]   ;;  %v3714_v31 = vld [vmem:[#allocation7 + $0x190] ss:$8 sps:$4 sm:$0xff]   ;;  %v384_v38 = vrot.slane %v4028_v12, %v375_v7 }
 0x1e8   :  { %v2183_v21 = vadd.f32 %v2166_v34, %v2157_v39  ;;  %v4125_v1 = vpop.f32.mrb[8].mxu0  ;;  %v3719_v34 = vld [vmem:[#allocation7 + $0x1a4] ss:$8 sps:$4 sm:$0xff]   ;;  %v400_v39 = vrot.slane %v380_v32, %v4076_v33 }
 0x1e9   :  { %v2184_v16 = vadd.f32 %v2170_v0, %v2158_v40  ;;  %v4127_v5 = vpop.f32.mrb[9].mxu0  ;;  %3212 = vmatpush3.bf16.msra.mxu1 %v3740_v2  ;;  %v3717_v0 = vld [vmem:[#allocation7 + $0x1a0] ss:$8 sps:$4 sm:$0xff]   ;;  %v3722_v40 = vld [vmem:[#allocation7 + $0x1b4] ss:$8 sps:$4 sm:$0xff]   ;;  %v2032_v2 = vrot.slane %v4028_v12, %v4041_v42 }
 0x1ea   :  { %v2187_v44 = vmax.f32 %v2183_v21, 0.0  ;;  %v1973_v10 = vpop.f32.mrb[10].mxu0  ;;  %3213 = vmatprep.subr.bf16.mxu1 %v3741_v6  ;;  %v404_v21 = vrot.slane %v384_v38, %v4076_v33  ;;  %v2080_v6 = vrot.slane %v4028_v12, %v4038_v41 }
 0x1eb   :  { %v2188_v45 = vmax.f32 %v2184_v16, 0.0  ;;  %v1974_v13 = vpop.f32.mrb[11].mxu0  ;;  %v3720_v16 = vld [vmem:[#allocation7 + $0x1b0] ss:$8 sps:$4 sm:$0xff]  }
 0x1ec   :  { %v2191_v58 = vpack.c.bf16 %v2187_v44, %v2187_v44  ;;  %v407_v44 = vmul.f32 %v400_v39, %v4043_v43 }
 0x1ed   :  { %v2192_v46 = vpack.c.bf16 %v2188_v45, %v2188_v45  ;;  %3214 = vmatpush3.bf16.msra.mxu1 %v3742_v37  ;;  %v3725_v45 = vld [vmem:[#allocation7 + $0x1c4] ss:$8 sps:$4 sm:$0xff]  }
 0x1ee   :  { %3215 = vmatprep.subr.bf16.mxu1 %v3743_v14  ;;  %v1888_v7 = vadd.f32 %v4091_v59, %v407_v44  ;;  %v3729_v59 = vld [vmem:[#allocation7 + $0x1e0] ss:$8 sps:$4 sm:$0xff]  }
 0x1ef   :  { %2623 = vmatprep.mubr.bf16.mxu0 %v2192_v46  ;;  %v408_v46 = vmul.f32 %v404_v21, %v4043_v43  ;;  %v3731_v43 = vld [vmem:[#allocation7 + $0x1e4] ss:$8 sps:$4 sm:$0xff]  }
 0x1f0   :  { %2624 = vmatmul.mubr.bf16.vlgmr.msra.gmra.mrb[12].mxu0 %v2191_v58 }
 0x1f1   :  { %2633 = vmatpush1.bf16.msra.mxu0 %v3687_v47  ;;  %3216 = vmatpush3.bf16.msra.mxu1 %v3744_v17  ;;  %v3728_v47 = vld [vmem:[#allocation7 + $0x1d4] ss:$8 sps:$4 sm:$0xff]   ;;  %v1890_v58 = vadd.f32 %v4093_v61, %v408_v46  ;;  %v3732_v61 = vld [vmem:[#allocation7 + $0x1f0] ss:$8 sps:$4 sm:$0xff]  }
 0x1f2   :  { %2634 = vmatprep.subr.bf16.mxu0 %v3692_v51  ;;  %3217 = vmatprep.subr.bf16.mxu1 %v3745_v19 }
 0x1f5   :  { %2635 = vmatpush1.bf16.msra.mxu0 %v3690_v55  ;;  %3218 = vmatpush3.bf16.msra.mxu1 %v3746_v23 }
 0x1f6   :  { %2636 = vmatprep.subr.bf16.mxu0 %v3695_v57  ;;  %v3726_v57 = vld [vmem:[#allocation7 + $0x1d0] ss:$8 sps:$4 sm:$0xff]  }
 0x1f9   :  { %2637 = vmatpush1.bf16.msra.mxu0 %v3693_v48 }
 0x1fa   :  { %2638 = vmatprep.subr.bf16.mxu0 %v3698_v49  ;;  %v3734_v49 = vld [vmem:[#allocation7 + $0x1f4] ss:$8 sps:$4 sm:$0xff]  }
 0x1fd   :  { %2639 = vmatpush1.bf16.msra.mxu0 %v3696_v9  ;;  %v2128_v9 = vrot.slane %v4028_v12, %v4063_v60 }
 0x1fe   :  { %2640 = vmatprep.subr.bf16.mxu0 %v3701_v11 }
 0x1ff   :  { %v2148_v13 = vrot.slane %v2128_v9, %v4063_v60 }
 0x201   :  { %2641 = vmatpush1.bf16.msra.mxu0 %v3699_v15  ;;  %v2155_v23 = vmul.f32 %v2148_v13, %v4069_v3  ;;  %v3747_v3 = vld [vmem:[#allocation8 + $0x70] sm:$0xff]  }
 0x202   :  { %2642 = vmatprep.subr.bf16.mxu0 %v3704_v36  ;;  %3219 = vmatprep.subr.bf16.mxu1 %v3747_v3 }
 0x205   :  { %2643 = vmatpush1.bf16.msra.mxu0 %v3702_v20 }
 0x206   :  { %2644 = vmatprep.subr.bf16.mxu0 %v3707_v22 }
 0x209   :  { %2645 = vmatpush1.bf16.msra.mxu0 %v3705_v56  ;;  %v2174_v56 = vrot.slane %v4117_v25, %v4038_v41 }
 0x20a   :  { %2646 = vmatprep.subr.bf16.mxu0 %v3710_v24  ;;  %v2178_v24 = vrot.slane %v4117_v25, %v4063_v60  ;;  %v2259_v60 = vld [vmem:[%s4187_s6] sm:$0x3]  ;;  %s3883_s6 = smov [#allocation10]  }
 0x20b   :  { %v2268_v25 = vrot.slane %v2259_v60, %v4041_v42  ;;  %s2859_s24 = sshll.u32 %s3883_s6, 4  ;;  %s2860_s24 = int_to_ptr.vmem [resolvable:$true] %s2859_s24 }
 0x20c   :  { %s3839_s25 = scalar_lea.vmem %s2860_s24, 128  ;;  %p3844_p5 = scmp.lt.s32.totalorder %s2860_s24, %s2860_s24 }
 0x20d   :  { %2647 = vmatpush1.bf16.msra.mxu0 %v3708_v27  ;;  %p3840_p4 = scmp.ne.s32.totalorder %s2860_s24, %s3839_s25  ;;  %p3845_p6 = scmp.lt.s32.totalorder %s3839_s25, %s3839_s25 }
 0x20e   :  { %2648 = vmatprep.subr.bf16.mxu0 %v3713_v28 }
 0x20f   :  { %p3846_p7 = por %p3845_p6, %p3844_p5 }
 0x211   :  { %2649 = vmatpush1.bf16.msra.mxu0 %v3711_v29  ;;  %p3847_p8 = pnand %p3846_p7, %p3840_p4 }
 0x212   :  { %2650 = vmatprep.subr.bf16.mxu0 %v3716_v30 }
 0x215   :  { %2651 = vmatpush1.bf16.msra.mxu0 %v3714_v31 }
 0x216   :  { %2652 = vmatprep.subr.bf16.mxu0 %v3719_v34  ;;  %v3748_v34 = vld [vmem:[#allocation8 + $0x30] sm:$0xff]  }
 0x217   :  { %3220 = vmatpush3.bf16.msra.mxu1 %v3748_v34 }
 0x219   :  { %2653 = vmatpush1.bf16.msra.mxu0 %v3717_v0 }
 0x21a   :  { %2654 = vmatprep.subr.bf16.mxu0 %v3722_v40 }
 0x21d   :  { %2655 = vmatpush1.bf16.msra.mxu0 %v3720_v16 }
 0x21e   :  { %2656 = vmatprep.subr.bf16.mxu0 %v3725_v45 }
 0x21f   :  { %v1928_v51 = vpop.f32.mrb[12].mxu1 }
 0x220   :  { %v1929_v52 = vadd.f32 %v1928_v51, %v1888_v7  ;;  %v1930_v53 = vpop.f32.mrb[13].mxu1 }
 0x221   :  { %v1931_v18 = vadd.f32 %v1930_v53, %v1890_v58  ;;  %v1932_v55 = vpop.f32.mrb[14].mxu1  ;;  %2657 = vmatpush1.bf16.msra.mxu0 %v3723_v35 }
 0x222   :  { %v1970_v62 = vadd.f32 %v4125_v1, %v1929_v52  ;;  %v1933_v63 = vpop.f32.mrb[15].mxu1  ;;  %2658 = vmatprep.subr.bf16.mxu0 %v3728_v47  ;;  %v2052_v1 = vrot.slane %v2032_v2, %v4041_v42  ;;  %v3190_v47 = vld [vmem:[%s4189_s8] ss:$0 sm:$0xff] }
 0x223   :  { %v1972_v48 = vadd.f32 %v4127_v5, %v1931_v18  ;;  %v2100_v5 = vrot.slane %v2080_v6, %v4038_v41  ;;  %v3749_v41 = vld [vmem:[#allocation8 + $0x78] sm:$0xff]  }
 0x224   :  { %v2059_v11 = vmul.f32 %v2052_v1, %v4056_v26  ;;  %3221 = vmatprep.subr.bf16.mxu1 %v3749_v41 }
 0x225   :  { %2659 = vmatpush1.bf16.msra.mxu0 %v3726_v57  ;;  %v2107_v17 = vmul.f32 %v2100_v5, %v4051_v50 }
 0x226   :  { %2660 = vmatprep.subr.bf16.mxu0 %v3731_v43 }
 0x229   :  { %2661 = vmatpush1.bf16.msra.mxu0 %v3729_v59 }
 0x22a   :  { %2662 = vmatprep.subr.bf16.mxu0 %v3734_v49 }
 0x22d   :  { %2663 = vmatpush1.bf16.msra.mxu0 %v3732_v61 }
 0x25f   :  { %v2010_v10 = vpop.f32.mrb[16].mxu1 }
 0x260   :  { %v2011_v37 = vadd.f32 %v2010_v10, %v1970_v62  ;;  %v2012_v14 = vpop.f32.mrb[17].mxu1 }
 0x261   :  { %v2013_v15 = vadd.f32 %v2012_v14, %v1972_v48  ;;  %v2014_v36 = vpop.f32.mrb[18].mxu1 }
 0x262   :  { %v2063_v19 = vadd.f32 %v2059_v11, %v2011_v37  ;;  %v2015_v20 = vpop.f32.mrb[19].mxu1 }
 0x263   :  { %v2064_v22 = vadd.f32 %v4059_v54, %v2013_v15 }
 0x264   :  { %v2111_v12 = vadd.f32 %v2107_v17, %v2063_v19 }
 0x265   :  { %v2112_v26 = vadd.f32 %v4054_v4, %v2064_v22  ;;  %v3750_v4 = vld [vmem:[#allocation8 + $0x38] sm:$0xff]  }
 0x266   :  { %v2159_v27 = vadd.f32 %v2155_v23, %v2111_v12  ;;  %3222 = vmatpush3.bf16.msra.mxu1 %v3750_v4 }
 0x267   :  { %v2160_v28 = vadd.f32 %v4072_v8, %v2112_v26  ;;  %v2264_v8 = vrot.slane %v2259_v60, %v4076_v33 }
 0x268   :  { %v2185_v29 = vadd.f32 %v2174_v56, %v2159_v27 }
 0x269   :  { %v2186_v50 = vadd.f32 %v2178_v24, %v2160_v28 }
 0x26a   :  { %v2189_v30 = vmax.f32 %v2185_v29, 0.0 }
 0x26b   :  { %v2190_v31 = vmax.f32 %v2186_v50, 0.0 }
 0x26c   :  { %v2193_v54 = vpack.c.bf16 %v2189_v30, %v2189_v30 }
 0x26d   :  { %v2194_v32 = vpack.c.bf16 %v2190_v31, %v2190_v31 }
 0x26f   :  { %2664 = vmatprep.mubr.bf16.mxu0 %v2194_v32 }
 0x270   :  { %2665 = vmatmul.mubr.bf16.vlgmr.msra.gmra.mrb[12].mxu0 %v2193_v54 }
 0x343   :  { %v2666_v38 = vpop.f32.mrb[12].mxu0 }
 0x344   :  { %v3229_v0 = vadd.f32 %v2666_v38, %v2264_v8  ;;  %v2668_v39 = vpop.f32.mrb[13].mxu0 }
 0x345   :  { %v3230_v40 = vadd.f32 %v2668_v39, %v2268_v25  ;;  %v2670_v21 = vpop.f32.mrb[14].mxu0 }
 0x346   :  { %v2673_v16 = vmax.f32 %v3229_v0, 0.0  ;;  %v2671_v44 = vpop.f32.mrb[15].mxu0 }
 0x347   :  { %v2674_v45 = vmax.f32 %v3230_v40, 0.0 }
 0x348   :  { %v2675_v35 = vpack.c.bf16 %v2673_v16, %v2673_v16 }
 0x349   :  { %v2676_v46 = vpack.c.bf16 %v2674_v45, %v2674_v45 }
 0x34b   :  { %2844 = vmatprep.mubr.bf16.mxu1 %v2676_v46 }
 0x34c   :  { %2845 = vmatmul.mubr.bf16.vlgmr.msra.gmra.mrb[20].mxu1 %v2675_v35 }
 0x41f   :  { %v3223_v7 = vpop.f32.mrb[20].mxu1 }
 0x420   :  { %v3224_v33 = vpop.f32.mrb[21].mxu1 }
 0x421   :  { %v3225_v42 = vadd.f32 %v3224_v33, %v3223_v7  ;;  %v3226_v58 = vpop.f32.mrb[22].mxu1 }
 0x422   :  { %v3227_v51 = vpop.f32.mrb[23].mxu1 }
 0x423   :  { %v2847_v52 = vadd.f32 %v3225_v42, %v3190_v47 }
 0x425   :  { %2852 = vst [vmem:[#allocation10] sm:$0xff] %v2847_v52 }
 0x426   :  { %3850 = shalt.err (!%p3847_p8)
}
 0x427   :  { %s3851_s8 = scalar_lea.hbm %s4190_s9, 128 }
 0x428   :  { %p3852_p9 = scmp.ne.s32.totalorder %s4190_s9, %s3851_s8  ;;  %p3855_p10 = scmp.lt.u32.totalorder %s3851_s8, %s4190_s9 }
 0x42a   :  { %p3857_p11 = pnand %p3855_p10, %p3852_p9 }
 0x42c   :  { %3860 = shalt.err (!%p3857_p11)
}
 0x42d   :  { %2862 = dma.vmem_to_hbm [thread:$0]  %s2860_s24, 128, %s4190_s9, [#allocation4]  }
 0x42e   :  { %3867 = dma.done.wait [#allocation4], 128  }
 0x42f   :  { %3868 = vsyncadd [#allocation4], 4294967168 }
 0x430   :  { %2866 = vsyncpa [#allocation3], 1 }
 0x431   :  { %2867 = vsyncpa [#allocation6], 1 }
 0x432   :  { %2868 = vsyncpa [#allocation9], 1 }
 0x433   :  { %2869 = vsyncpa [#allocation4], 1 }

</bundles_post_ra>
